<compile_context>
chip_gen: v6e
topology: v6e:2x2x1
jax: 0.10.0
libtpu: 0.0.40
codegen_flags: <defaults>
</compile_context>

<pallas_src>
import math

import jax
import jax.numpy as jnp
from jax import lax
from jax.experimental import pallas as pl
from jax.experimental.pallas import tpu as pltpu


def mha2_kernel(xq_ref, xk_ref, xv_ref, wq_ref, wk_ref, wv_ref,
                bq_ref, bk_ref, bv_ref, o_ref):
    """Processes one row-tile of batch elements entirely in VMEM/vregs."""
    xq = xq_ref[...]                                      # (TB, H) raw queries (also residual)

    # Three separate (H, H) MXU matmuls; weights are pre-transposed on the host and
    # 1/sqrt(H) is already folded into wq/bq.  q/k/v are separate slabs -> no
    # lane-offset slicing of a fused wide output.
    q = jnp.maximum(
        jnp.dot(xq, wq_ref[...], preferred_element_type=jnp.float32) + bq_ref[...], 0.0)
    k = jnp.maximum(
        jnp.dot(xk_ref[...], wk_ref[...], preferred_element_type=jnp.float32) + bk_ref[...], 0.0)
    v = jnp.maximum(
        jnp.dot(xv_ref[...], wv_ref[...], preferred_element_type=jnp.float32) + bv_ref[...], 0.0)

    # Stable-softmax max from k alone.  Precondition: q >= 0 and k >= 0 (post-ReLU)
    # and the folded scale is > 0, hence max_j q_i*k_j = q_i * max_j k_j.
    kmax = jnp.max(k, axis=-1, keepdims=True)             # (TB, 1)   O(TB*H) reduce
    k_shift = k - kmax                                    # (TB, H), all entries <= 0

    # score_shifted[b, i, j] = q[b, i] * (k[b, j] - kmax[b])  ==  score - rowmax(score).
    # Batched size-1 contraction keeps both operands lane-major (no in-kernel transposes).
    score_shift = lax.dot_general(
        q[:, None, :], k_shift[:, None, :],
        dimension_numbers=(((1,), (1,)), ((0,), (0,))),
        preferred_element_type=jnp.float32)               # (TB, H, H)

    # exponent <= 0  ->  p in (0, 1]; row max contributes exp(0)=1 so denom >= 1.
    # (Also makes any padded rows of a ragged last tile benign: no inf / div-by-zero.)
    p = jnp.exp(score_shift)                              # (TB, H, H)

    denom = jnp.sum(p, axis=-1)                           # (TB, H)
    # Un-normalized value contraction first, then one cheap (TB, H) normalization:
    ctx = jnp.sum(p * v[:, None, :], axis=-1)             # (TB, H)
    out = ctx * pl.reciprocal(denom, approx=True) + xq    # EUP vrcp; residual w/ raw queries
    o_ref[...] = out.astype(o_ref.dtype)


def mha2_forward(queries, keys, values, wq, bq, wk, bk, wv, bv, *, block_rows=256):
    """queries/keys/values: (B, H); weights in PyTorch nn.Linear layout W:(out,in), b:(out,).

    block_rows: row-tile size.  v5e/v6e (single TC, 128 MiB VMEM) prefer the largest tile
    that fits (256-512 for moderate H); on v7x pick it so the grid has >= 2 parallel steps
    for the real batch so both TensorCores are used.
    """
    B, H = queries.shape
    scale = 1.0 / math.sqrt(float(H))                     # plain Python float

    # Host-side layout plumbing (free): transpose weights to (in, out) so the kernel
    # never transposes on the XLU, and fold the positive softmax scale into Wq / bq
    # (ReLU(scale*z) == scale*ReLU(z) for scale > 0).
    wq_t = (wq.T * scale).astype(wq.dtype)
    wk_t = wk.T
    wv_t = wv.T
    bq_s = (bq * scale).reshape(1, H).astype(bq.dtype)
    bk_r = bk.reshape(1, H)
    bv_r = bv.reshape(1, H)

    tb = B if B <= block_rows else block_rows
    grid = (pl.cdiv(B, tb),)

    row_spec = pl.BlockSpec((tb, H), lambda r: (r, 0))
    w_spec = pl.BlockSpec((H, H), lambda r: (0, 0))       # grid-invariant (resident)
    b_spec = pl.BlockSpec((1, H), lambda r: (0, 0))       # grid-invariant (resident)

    return pl.pallas_call(
        mha2_kernel,
        out_shape=jax.ShapeDtypeStruct((B, H), queries.dtype),
        grid_spec=pltpu.PrefetchScalarGridSpec(
            num_scalar_prefetch=0,
            grid=grid,
            in_specs=[
                row_spec, row_spec, row_spec,             # queries / keys / values row tiles
                w_spec, w_spec, w_spec,                   # Wq.T (pre-scaled), Wk.T, Wv.T
                b_spec, b_spec, b_spec,                    # bq (pre-scaled), bk, bv
            ],
            out_specs=row_spec,
        ),
        compiler_params=pltpu.CompilerParams(
            dimension_semantics=("parallel",)),
    )(queries, keys, values, wq_t, wk_t, wv_t, bq_s, bk_r, bv_r)


def mha2_reference(queries, keys, values, wq, bq, wk, bk, wv, bv):
    """Pure-JAX mirror of MultiHeadAttention2.forward."""
    q = jax.nn.relu(queries @ wq.T + bq)
    k = jax.nn.relu(keys @ wk.T + bk)
    v = jax.nn.relu(values @ wv.T + bv)
    score = q[:, :, None] * k[:, None, :] / jnp.sqrt(jnp.float32(k.shape[-1]))
    attn = jax.nn.softmax(score, axis=-1)
    a = jnp.einsum("bij,bj->bi", attn, v)
    return a + queries


if __name__ == "__main__":
    # forward() implies 2-D (batch, num_hiddens) inputs.
    B, H = 8, 32

    key = jax.random.PRNGKey(0)
    ks = jax.random.split(key, 9)
    bound = 1.0 / math.sqrt(float(H))

    xq = jax.random.normal(ks[0], (B, H), jnp.float32)
    xk = jax.random.normal(ks[1], (B, H), jnp.float32)
    xv = jax.random.normal(ks[2], (B, H), jnp.float32)
    wq = jax.random.uniform(ks[3], (H, H), jnp.float32, -bound, bound)
    wk = jax.random.uniform(ks[4], (H, H), jnp.float32, -bound, bound)
    wv = jax.random.uniform(ks[5], (H, H), jnp.float32, -bound, bound)
    bq = jax.random.uniform(ks[6], (H,), jnp.float32, -bound, bound)
    bk = jax.random.uniform(ks[7], (H,), jnp.float32, -bound, bound)
    bv = jax.random.uniform(ks[8], (H,), jnp.float32, -bound, bound)

    out = mha2_forward(xq, xk, xv, wq, bq, wk, bk, wv, bv)
    out = jax.block_until_ready(out)

    ref = mha2_reference(xq, xk, xv, wq, bq, wk, bk, wv, bv)
    assert out.shape == (B, H)
    max_err = jnp.max(jnp.abs(out - ref))
    assert jnp.allclose(out, ref, atol=1e-3, rtol=1e-3), f"mismatch vs reference: {max_err}"

    print("KERNEL_OK")
</pallas_src>

<mosaic_0001>
module attributes {stable_mosaic.version = 11 : i64} {
  func.func @mha2_kernel(%arg0: i32, %arg1: memref<8x32xf32, #tpu.memory_space<vmem>>, %arg2: memref<8x32xf32, #tpu.memory_space<vmem>>, %arg3: memref<8x32xf32, #tpu.memory_space<vmem>>, %arg4: memref<32x32xf32, #tpu.memory_space<vmem>>, %arg5: memref<32x32xf32, #tpu.memory_space<vmem>>, %arg6: memref<32x32xf32, #tpu.memory_space<vmem>>, %arg7: memref<1x32xf32, #tpu.memory_space<vmem>>, %arg8: memref<1x32xf32, #tpu.memory_space<vmem>>, %arg9: memref<1x32xf32, #tpu.memory_space<vmem>>, %arg10: memref<8x32xf32, #tpu.memory_space<vmem>>) attributes {dimension_semantics = [#tpu.dimension_semantics<parallel>], iteration_bounds = array<i64: 1>, scalar_prefetch = 0 : i64, scratch_operands = 0 : i64, tpu.core_type = #tpu.core_type<tc>, window_params = [{transform_indices = @transform_0, window_bounds = array<i64: 8, 32>}, {transform_indices = @transform_1, window_bounds = array<i64: 8, 32>}, {transform_indices = @transform_2, window_bounds = array<i64: 8, 32>}, {pipeline_mode = #tpu.pipeline_mode<synchronous>, transform_indices = @transform_3, window_bounds = array<i64: 32, 32>}, {pipeline_mode = #tpu.pipeline_mode<synchronous>, transform_indices = @transform_4, window_bounds = array<i64: 32, 32>}, {pipeline_mode = #tpu.pipeline_mode<synchronous>, transform_indices = @transform_5, window_bounds = array<i64: 32, 32>}, {pipeline_mode = #tpu.pipeline_mode<synchronous>, transform_indices = @transform_6, window_bounds = array<i64: 1, 32>}, {pipeline_mode = #tpu.pipeline_mode<synchronous>, transform_indices = @transform_7, window_bounds = array<i64: 1, 32>}, {pipeline_mode = #tpu.pipeline_mode<synchronous>, transform_indices = @transform_8, window_bounds = array<i64: 1, 32>}, {transform_indices = @transform_9, window_bounds = array<i64: 8, 32>}]} {
    %c0 = arith.constant 0 : index
    %c0_0 = arith.constant 0 : index
    %0 = vector.load %arg1[%c0, %c0_0] : memref<8x32xf32, #tpu.memory_space<vmem>>, vector<8x32xf32>
    %c0_1 = arith.constant 0 : index
    %c0_2 = arith.constant 0 : index
    %1 = vector.load %arg4[%c0_1, %c0_2] : memref<32x32xf32, #tpu.memory_space<vmem>>, vector<32x32xf32>
    %cst = arith.constant dense<0.000000e+00> : vector<8x32xf32>
    %2 = tpu.matmul %0, %1, %cst {dimension_numbers = #tpu.dot_dimension_numbers<[1], [0], [0], [1], [0, 0, 1, 1], [], []>} : vector<8x32xf32>, vector<32x32xf32>, vector<8x32xf32> -> vector<8x32xf32>
    %c0_3 = arith.constant 0 : index
    %c0_4 = arith.constant 0 : index
    %3 = vector.load %arg7[%c0_3, %c0_4] : memref<1x32xf32, #tpu.memory_space<vmem>>, vector<1x32xf32>
    %4 = vector.broadcast %3 : vector<1x32xf32> to vector<8x32xf32>
    %5 = arith.addf %2, %4 : vector<8x32xf32>
    %cst_5 = arith.constant 0.000000e+00 : f32
    %6 = vector.broadcast %cst_5 : f32 to vector<8x32xf32>
    %7 = arith.maximumf %5, %6 : vector<8x32xf32>
    %c0_6 = arith.constant 0 : index
    %c0_7 = arith.constant 0 : index
    %8 = vector.load %arg2[%c0_6, %c0_7] : memref<8x32xf32, #tpu.memory_space<vmem>>, vector<8x32xf32>
    %c0_8 = arith.constant 0 : index
    %c0_9 = arith.constant 0 : index
    %9 = vector.load %arg5[%c0_8, %c0_9] : memref<32x32xf32, #tpu.memory_space<vmem>>, vector<32x32xf32>
    %cst_10 = arith.constant dense<0.000000e+00> : vector<8x32xf32>
    %10 = tpu.matmul %8, %9, %cst_10 {dimension_numbers = #tpu.dot_dimension_numbers<[1], [0], [0], [1], [0, 0, 1, 1], [], []>} : vector<8x32xf32>, vector<32x32xf32>, vector<8x32xf32> -> vector<8x32xf32>
    %c0_11 = arith.constant 0 : index
    %c0_12 = arith.constant 0 : index
    %11 = vector.load %arg8[%c0_11, %c0_12] : memref<1x32xf32, #tpu.memory_space<vmem>>, vector<1x32xf32>
    %12 = vector.broadcast %11 : vector<1x32xf32> to vector<8x32xf32>
    %13 = arith.addf %10, %12 : vector<8x32xf32>
    %cst_13 = arith.constant 0.000000e+00 : f32
    %14 = vector.broadcast %cst_13 : f32 to vector<8x32xf32>
    %15 = arith.maximumf %13, %14 : vector<8x32xf32>
    %c0_14 = arith.constant 0 : index
    %c0_15 = arith.constant 0 : index
    %16 = vector.load %arg3[%c0_14, %c0_15] : memref<8x32xf32, #tpu.memory_space<vmem>>, vector<8x32xf32>
    %c0_16 = arith.constant 0 : index
    %c0_17 = arith.constant 0 : index
    %17 = vector.load %arg6[%c0_16, %c0_17] : memref<32x32xf32, #tpu.memory_space<vmem>>, vector<32x32xf32>
    %cst_18 = arith.constant dense<0.000000e+00> : vector<8x32xf32>
    %18 = tpu.matmul %16, %17, %cst_18 {dimension_numbers = #tpu.dot_dimension_numbers<[1], [0], [0], [1], [0, 0, 1, 1], [], []>} : vector<8x32xf32>, vector<32x32xf32>, vector<8x32xf32> -> vector<8x32xf32>
    %c0_19 = arith.constant 0 : index
    %c0_20 = arith.constant 0 : index
    %19 = vector.load %arg9[%c0_19, %c0_20] : memref<1x32xf32, #tpu.memory_space<vmem>>, vector<1x32xf32>
    %20 = vector.broadcast %19 : vector<1x32xf32> to vector<8x32xf32>
    %21 = arith.addf %18, %20 : vector<8x32xf32>
    %cst_21 = arith.constant 0.000000e+00 : f32
    %22 = vector.broadcast %cst_21 : f32 to vector<8x32xf32>
    %23 = arith.maximumf %21, %22 : vector<8x32xf32>
    %cst_22 = arith.constant dense<0xFF800000> : vector<8xf32>
    %24 = vector.multi_reduction <maximumf>, %15, %cst_22 [1] : vector<8x32xf32> to vector<8xf32>
    %25 = vector.shape_cast %24 : vector<8xf32> to vector<8x1xf32>
    %26 = vector.broadcast %25 : vector<8x1xf32> to vector<8x32xf32>
    %27 = arith.subf %15, %26 : vector<8x32xf32>
    %28 = vector.shape_cast %7 : vector<8x32xf32> to vector<8x1x32xf32>
    %29 = vector.shape_cast %27 : vector<8x32xf32> to vector<8x1x32xf32>
    %cst_23 = arith.constant dense<0.000000e+00> : vector<8x32x32xf32>
    %30 = tpu.matmul %28, %29, %cst_23 {dimension_numbers = #tpu.dot_dimension_numbers<[1], [1], [2], [2], [0, 0, 0, 2, 1, 2], [0], [0]>} : vector<8x1x32xf32>, vector<8x1x32xf32>, vector<8x32x32xf32> -> vector<8x32x32xf32>
    %31 = math.exp %30 : vector<8x32x32xf32>
    %cst_24 = arith.constant dense<0.000000e+00> : vector<8x32xf32>
    %32 = vector.multi_reduction <add>, %31, %cst_24 [2] : vector<8x32x32xf32> to vector<8x32xf32>
    %33 = vector.shape_cast %23 : vector<8x32xf32> to vector<8x1x32xf32>
    %34 = vector.broadcast %33 : vector<8x1x32xf32> to vector<8x32x32xf32>
    %35 = arith.mulf %31, %34 : vector<8x32x32xf32>
    %cst_25 = arith.constant dense<0.000000e+00> : vector<8x32xf32>
    %36 = vector.multi_reduction <add>, %35, %cst_25 [2] : vector<8x32x32xf32> to vector<8x32xf32>
    %37 = tpu.reciprocal %32 {approx = true} : vector<8x32xf32> -> vector<8x32xf32>
    %38 = arith.mulf %36, %37 : vector<8x32xf32>
    %39 = arith.addf %38, %0 : vector<8x32xf32>
    %c0_26 = arith.constant 0 : index
    %c0_27 = arith.constant 0 : index
    %40 = vector.load %arg10[%c0_26, %c0_27] : memref<8x32xf32, #tpu.memory_space<vmem>>, vector<8x32xf32>
    tpu.vector_store %arg10[%c0_26, %c0_27], %39 {strides = array<i32>} : memref<8x32xf32, #tpu.memory_space<vmem>>, vector<8x32xf32>,
    return
  }
  func.func @transform_0(%arg0: i32) -> (i32, i32) {
    %c0_i32 = arith.constant 0 : i32
    %c0_i32_0 = arith.constant 0 : i32
    return %arg0, %c0_i32 : i32, i32
  }
  func.func @transform_1(%arg0: i32) -> (i32, i32) {
    %c0_i32 = arith.constant 0 : i32
    %c0_i32_0 = arith.constant 0 : i32
    return %arg0, %c0_i32 : i32, i32
  }
  func.func @transform_2(%arg0: i32) -> (i32, i32) {
    %c0_i32 = arith.constant 0 : i32
    %c0_i32_0 = arith.constant 0 : i32
    return %arg0, %c0_i32 : i32, i32
  }
  func.func @transform_3(%arg0: i32) -> (i32, i32) {
    %c0_i32 = arith.constant 0 : i32
    %c0_i32_0 = arith.constant 0 : i32
    %c0_i32_1 = arith.constant 0 : i32
    return %c0_i32, %c0_i32_0 : i32, i32
  }
  func.func @transform_4(%arg0: i32) -> (i32, i32) {
    %c0_i32 = arith.constant 0 : i32
    %c0_i32_0 = arith.constant 0 : i32
    %c0_i32_1 = arith.constant 0 : i32
    return %c0_i32, %c0_i32_0 : i32, i32
  }
  func.func @transform_5(%arg0: i32) -> (i32, i32) {
    %c0_i32 = arith.constant 0 : i32
    %c0_i32_0 = arith.constant 0 : i32
    %c0_i32_1 = arith.constant 0 : i32
    return %c0_i32, %c0_i32_0 : i32, i32
  }
  func.func @transform_6(%arg0: i32) -> (i32, i32) {
    %c0_i32 = arith.constant 0 : i32
    %c0_i32_0 = arith.constant 0 : i32
    %c0_i32_1 = arith.constant 0 : i32
    return %c0_i32, %c0_i32_0 : i32, i32
  }
  func.func @transform_7(%arg0: i32) -> (i32, i32) {
    %c0_i32 = arith.constant 0 : i32
    %c0_i32_0 = arith.constant 0 : i32
    %c0_i32_1 = arith.constant 0 : i32
    return %c0_i32, %c0_i32_0 : i32, i32
  }
  func.func @transform_8(%arg0: i32) -> (i32, i32) {
    %c0_i32 = arith.constant 0 : i32
    %c0_i32_0 = arith.constant 0 : i32
    %c0_i32_1 = arith.constant 0 : i32
    return %c0_i32, %c0_i32_0 : i32, i32
  }
  func.func @transform_9(%arg0: i32) -> (i32, i32) {
    %c0_i32 = arith.constant 0 : i32
    %c0_i32_0 = arith.constant 0 : i32
    return %arg0, %c0_i32 : i32, i32
  }
}

</mosaic_0001>

<bundles_post_ra>
// kernel: tpu_custom_call.1
= control target key start
LH: loop header
LB: loop body
LE: loop exit
PB: predicated region body
PF: predicated region fallthrough
CT: control target
= control target key end

     0   :  { %14 = vsyncpa [#allocation3], 0  ;;  %s3583_s0 = inlined_call_operand.hbm [shape: f32[8,32], index: 0, kind: input, shape index: {}]   ;;  %s3584_s1 = inlined_call_operand.hbm [shape: f32[8,32], index: 1, kind: input, shape index: {}]   ;;  %s3585_s2 = inlined_call_operand.hbm [shape: f32[8,32], index: 2, kind: input, shape index: {}]   ;;  %s3586_s3 = inlined_call_operand.hbm [shape: f32[32,32], index: 3, kind: input, shape index: {}]   ;;  %s3587_s4 = inlined_call_operand.hbm [shape: f32[32,32], index: 4, kind: input, shape index: {}]   ;;  %s3588_s5 = inlined_call_operand.hbm [shape: f32[32,32], index: 5, kind: input, shape index: {}]   ;;  %s3589_s6 = inlined_call_operand.vmem [shape: f32[1,32], index: 6, kind: input, shape index: {}]   ;;  %s3590_s7 = inlined_call_operand.vmem [shape: f32[1,32], index: 7, kind: input, shape index: {}]   ;;  %s3591_s8 = inlined_call_operand.vmem [shape: f32[1,32], index: 8, kind: input, shape index: {}]   ;;  %s3592_s9 = inlined_call_operand.hbm [shape: f32[8,32], index: 9, kind: output, shape index: {}]  }
   0x1   :  { %15 = vsyncpa [#allocation6], 0 }
   0x2   :  { %16 = vsyncpa [#allocation9], 0 }
   0x3   :  { %17 = vsyncpa [#allocation12], 0 }
   0x4   :  { %18 = vsyncpa [#allocation4], 0  ;;  %s3003_s30 = smov [#allocation5]   ;;  %s3004_s11 = smov [#allocation8]  }
   0x5   :  { %s35_s10 = sshll.u32 %s3003_s30, 4  ;;  %s54_s12 = sshll.u32 %s3004_s11, 4  ;;  %s36_s10 = int_to_ptr.vmem [resolvable:$true] %s35_s10  ;;  %s55_s12 = int_to_ptr.vmem [resolvable:$true] %s54_s12 }
   0x6   :  { %s2861_s13 = scalar_lea.vmem %s36_s10, 128  ;;  %p2866_p1 = scmp.lt.s32.totalorder %s36_s10, %s36_s10 }
   0x7   :  { %p2862_p0 = scmp.ne.s32.totalorder %s36_s10, %s2861_s13  ;;  %p2867_p2 = scmp.lt.s32.totalorder %s2861_s13, %s2861_s13 }
   0x9   :  { %p2868_p3 = por %p2867_p2, %p2866_p1 }
   0xb   :  { %p2869_p4 = pnand %p2868_p3, %p2862_p0 }
   0xd   :  { %2872 = shalt.err (!%p2869_p4)
}
   0xe   :  { %38 = dma.hbm_to_vmem [thread:$0]  %s3584_s1, 128, %s36_s10, [#allocation6]  }
   0xf   :  { %s2881_s16 = scalar_lea.vmem %s55_s12, 512  ;;  %p2886_p6 = scmp.lt.s32.totalorder %s55_s12, %s55_s12 }
  0x10   :  { %p2882_p5 = scmp.ne.s32.totalorder %s55_s12, %s2881_s16  ;;  %p2887_p7 = scmp.lt.s32.totalorder %s2881_s16, %s2881_s16 }
  0x12   :  { %p2888_p8 = por %p2887_p7, %p2886_p6 }
  0x14   :  { %p2889_p9 = pnand %p2888_p8, %p2882_p5 }
  0x16   :  { %2892 = shalt.err (!%p2889_p9)
}
  0x17   :  { %s3005_s17 = smov 128   ;;  %s3006_s18 = smov 8  }
  0x18   :  { %60 = dma.hbm_to_vmem [thread:$0]  %s3586_s3, 512, %s55_s12, [#allocation9], %s3005_s17, %s3005_s17, %s3006_s18  }
  0x19   :  { %s3007_s21 = smov [#allocation2]   ;;  %s3008_s23 = smov [#allocation7]  }
  0x1a   :  { %s25_s22 = sshll.u32 %s3007_s21, 4  ;;  %s45_s1 = sshll.u32 %s3008_s23, 4  ;;  %s26_s22 = int_to_ptr.vmem [resolvable:$true] %s25_s22  ;;  %s46_s1 = int_to_ptr.vmem [resolvable:$true] %s45_s1 }
  0x1b   :  { %s2901_s24 = scalar_lea.vmem %s26_s22, 128  ;;  %p2906_p11 = scmp.lt.s32.totalorder %s26_s22, %s26_s22 }
  0x1c   :  { %p2902_p10 = scmp.ne.s32.totalorder %s26_s22, %s2901_s24  ;;  %p2907_p12 = scmp.lt.s32.totalorder %s2901_s24, %s2901_s24 }
  0x1e   :  { %p2908_p13 = por %p2907_p12, %p2906_p11 }
  0x20   :  { %p2909_p0 = pnand %p2908_p13, %p2902_p10 }
  0x22   :  { %2912 = shalt.err (!%p2909_p0)
}
  0x23   :  { %28 = dma.hbm_to_vmem [thread:$0]  %s3583_s0, 128, %s26_s22, [#allocation3]  }
  0x24   :  { %s2921_s27 = scalar_lea.vmem %s46_s1, 128  ;;  %p2926_p2 = scmp.lt.s32.totalorder %s46_s1, %s46_s1 }
  0x25   :  { %p2922_p1 = scmp.ne.s32.totalorder %s46_s1, %s2921_s27  ;;  %p2927_p3 = scmp.lt.s32.totalorder %s2921_s27, %s2921_s27 }
  0x27   :  { %p2928_p4 = por %p2927_p3, %p2926_p2 }
  0x29   :  { %p2929_p5 = pnand %p2928_p4, %p2922_p1 }
  0x2b   :  { %2932 = shalt.err (!%p2929_p5)
}
  0x2c   :  { %48 = dma.hbm_to_vmem [thread:$0]  %s3585_s2, 128, %s46_s1, [#allocation6]  }
  0x2d   :  { %s3009_s29 = smov [#allocation10]   ;;  %s3010_s10 = smov [#allocation11]  }
  0x2e   :  { %s66_s30 = sshll.u32 %s3009_s29, 4  ;;  %s78_s11 = sshll.u32 %s3010_s10, 4  ;;  %s67_s30 = int_to_ptr.vmem [resolvable:$true] %s66_s30  ;;  %s79_s11 = int_to_ptr.vmem [resolvable:$true] %s78_s11 }
  0x2f   :  { %s2941_s12 = scalar_lea.vmem %s67_s30, 512  ;;  %p2946_p7 = scmp.lt.s32.totalorder %s67_s30, %s67_s30 }
  0x30   :  { %p2942_p6 = scmp.ne.s32.totalorder %s67_s30, %s2941_s12  ;;  %p2947_p8 = scmp.lt.s32.totalorder %s2941_s12, %s2941_s12 }
  0x32   :  { %p2948_p9 = por %p2947_p8, %p2946_p7 }
  0x34   :  { %p2949_p10 = pnand %p2948_p9, %p2942_p6 }
  0x36   :  { %2952 = shalt.err (!%p2949_p10)
}
  0x37   :  { %72 = dma.hbm_to_vmem [thread:$0]  %s3587_s4, 512, %s67_s30, [#allocation9], %s3005_s17, %s3005_s17, %s3006_s18  }
  0x38   :  { %s2961_s2 = scalar_lea.vmem %s79_s11, 512  ;;  %p2966_p12 = scmp.lt.s32.totalorder %s79_s11, %s79_s11 }
  0x39   :  { %p2962_p11 = scmp.ne.s32.totalorder %s79_s11, %s2961_s2  ;;  %p2967_p13 = scmp.lt.s32.totalorder %s2961_s2, %s2961_s2 }
  0x3b   :  { %p2968_p0 = por %p2967_p13, %p2966_p12 }
  0x3d   :  { %p2969_p1 = pnand %p2968_p0, %p2962_p11 }
  0x3f   :  { %2972 = shalt.err (!%p2969_p1)
}
  0x40   :  { %84 = dma.hbm_to_vmem [thread:$0]  %s3588_s5, 512, %s79_s11, [#allocation12], %s3005_s17, %s3005_s17, %s3006_s18  }
  0x41   :  { %2993 = dma.done.wait [#allocation3], 128  }
  0x42   :  { %2994 = vsyncadd [#allocation3], 4294967168 }
  0x43   :  { %2995 = dma.done.wait [#allocation6], 256  }
  0x44   :  { %2996 = vsyncadd [#allocation6], 4294967040 }
  0x45   :  { %2997 = dma.done.wait [#allocation9], 1024  }
  0x46   :  { %2998 = vsyncadd [#allocation9], 4294966272 }
  0x47   :  { %2999 = dma.done.wait [#allocation12], 512  }
  0x48   :  { %3000 = vsyncadd [#allocation12], 4294966784  ;;  %v3011_v0 = vmov 0.0   ;;  %vm3012_vm0 = vmmov 0   ;;  %v113_v1 = vld [vmem:[#allocation8 + $0x18] sm:$0xff]  ;;  %v112_v3 = vld [vmem:[#allocation8 + $0x10] sm:$0xff]  ;;  %v377_v13 = vlaneseq }
  0x49   :  { %2611 = vmatprep.subr.mxu0 %v3011_v0  ;;  %2622 = vmatprep.subr.mxu1 %v3011_v0  ;;  %v200_v2 = vld [vmem:[#allocation10 + $0x18] sm:$0xff]  ;;  %v199_v4 = vld [vmem:[#allocation10 + $0x10] sm:$0xff]  ;;  %v111_v5 = vld [vmem:[#allocation8 + $0x8] sm:$0xff]  ;;  %vm121_vm1 = vcmask 261120   ;;  %v3013_v11 = vmov 1966171168  }
  0x4a   :  { %2619 = vmatprep.mubr.msk.f32.mxu0 %vm3012_vm0, %v3011_v0  ;;  %2630 = vmatprep.mubr.msk.f32.mxu1 %vm3012_vm0, %v3011_v0  ;;  %v198_v6 = vld [vmem:[#allocation10 + $0x8] sm:$0xff]  ;;  %v110_v7 = vld [vmem:[#allocation8] sm:$0xff]  ;;  %v196_v10 = vld [vmem:[#allocation5] sm:$0xff]  ;;  %v375_v12 = vunpack.c.l.s4 %v3013_v11  ;;  %v3114_v15 = vshrl.u32 %v377_v13, 7  ;;  %vm512_vm2 = vcmask 7168   ;;  %vm525_vm3 = vcmask 1040384  }
  0x4b   :  { %2612 = vmatpush3.msra.mxu0 %v113_v1  ;;  %2623 = vmatpush3.msra.mxu1 %v200_v2  ;;  %v197_v8 = vld [vmem:[#allocation10] sm:$0xff]  ;;  %v3103_v9 = vld [vmem:[#allocation2] sm:$0xff]  ;;  %v286_v31 = vld [vmem:[#allocation11 + $0x18] sm:$0xff]  ;;  %vm2327_vm4 = vcmask 130112   ;;  %vm2334_vm5 = vcmask 195712   ;;  %vm2341_vm6 = vcmask 261312  }
  0x4c   :  { %2613 = vmatprep.subr.mxu0 %v3011_v0  ;;  %2624 = vmatprep.subr.mxu1 %v3011_v0  ;;  %v376_v14 = vunpack.c.0.s8 %v375_v12  ;;  %v2510_v16 = vld [vmem:[%s3589_s6] ss:$0 sm:$0xff]  ;;  %v285_v32 = vld [vmem:[#allocation11 + $0x10] sm:$0xff]  ;;  %v283_v35 = vld [vmem:[#allocation11] sm:$0xff]  ;;  %v3137_v45 = vsub.s32 0, %v3114_v15  ;;  %v1993_v52 = vsub.s32 1, %v3114_v15 }
  0x4d   :  { %2614 = vmatpush3.msra.mxu0 %v112_v3  ;;  %2625 = vmatpush3.msra.mxu1 %v199_v4  ;;  %v2512_v17 = vld [vmem:[%s3590_s7] ss:$0 sm:$0xff]  ;;  %v282_v36 = vld [vmem:[#allocation7] sm:$0xff]  ;;  %v2012_v58 = vsub.s32 2, %v3114_v15  ;;  %vm2476_vm7 = vcmask 1041409   ;;  %vm2478_vm8 = vcmask 1042434  }
  0x4e   :  { %2615 = vmatprep.subr.mxu0 %v3011_v0  ;;  %2626 = vmatprep.subr.mxu1 %v3011_v0  ;;  %v3123_v21 = vsub.s32 %v376_v14, %v3114_v15  ;;  %v284_v33 = vld [vmem:[#allocation11 + $0x8] sm:$0xff]  ;;  %v3141_v46 = vrot.slane %v3103_v9, %v3137_v45  ;;  %v3151_v54 = vrot.slane %v3103_v9, %v1993_v52  ;;  %vm2480_vm9 = vcmask 1043459  }
  0x4f   :  { %2616 = vmatpush3.msra.mxu0 %v111_v5  ;;  %2627 = vmatpush3.msra.mxu1 %v198_v6  ;;  %v3171_v1 = vrot.slane %v3103_v9, %v2012_v58  ;;  %v2031_v5 = vsub.s32 3, %v3114_v15  ;;  %vm2482_vm10 = vcmask 1044484   ;;  %vm2484_vm11 = vcmask 1045509  }
  0x50   :  { %2617 = vmatprep.subr.mxu0 %v3011_v0  ;;  %2628 = vmatprep.subr.mxu1 %v3011_v0  ;;  %vm2486_vm12 = vcmask 1046534   ;;  %vm2488_vm13 = vcmask 1047559  }
  0x51   :  { %2618 = vmatpush3.msra.mxu0 %v110_v7  ;;  %2629 = vmatpush3.msra.mxu1 %v197_v8  ;;  %v3185_v7 = vrot.slane %v3103_v9, %v2031_v5 }
  0x52   :  { %2620 = vmatmul.mubr.msk.f32.vlgmr.msra.gmra.mxu0 %vm121_vm1, %v3103_v9  ;;  %2631 = vmatmul.mubr.msk.f32.vlgmr.msra.gmra.mxu1 %vm121_vm1, %v196_v10  ;;  %v2050_v10 = vsub.s32 4, %v3114_v15 }
  0x53   :  { %2633 = vmatprep.subr.mxu0 %v3011_v0  ;;  %2641 = vmatprep.mubr.msk.f32.mxu0 %vm3012_vm0, %v3011_v0 }
  0x54   :  { %2634 = vmatpush3.msra.mxu0 %v286_v31  ;;  %v3191_v12 = vrot.slane %v3103_v9, %v2050_v10 }
  0x55   :  { %2635 = vmatprep.subr.mxu0 %v3011_v0 }
  0x56   :  { %2636 = vmatpush3.msra.mxu0 %v285_v32 }
  0x57   :  { %2637 = vmatprep.subr.mxu0 %v3011_v0 }
  0x58   :  { %2638 = vmatpush3.msra.mxu0 %v284_v33 }
  0x59   :  { %2639 = vmatprep.subr.mxu0 %v3011_v0 }
  0x5a   :  { %2640 = vmatpush3.msra.mxu0 %v283_v35 }
  0x5b   :  { %2642 = vmatmul.mubr.msk.f32.vlgmr.msra.gmra.mxu0 %vm121_vm1, %v282_v36 }
 0x112   :  { %v191_v18 = vpop.f32.mrf.mxu0  ;;  %v277_v19 = vpop.f32.mrf.mxu1 }
 0x113   :  { %v192_v20 = vadd.f32 %v2510_v16, %v191_v18  ;;  %v278_v22 = vadd.f32 %v2512_v17, %v277_v19  ;;  %v2069_v16 = vsub.s32 5, %v3114_v15 }
 0x114   :  { %v2632_v23 = vpop.f32.mrf.mxu1  ;;  %v2621_v24 = vpop.f32.mrf.mxu0 }
 0x115   :  { %v195_v25 = vmax.f32 %v192_v20, 0.0  ;;  %v281_v26 = vmax.f32 %v278_v22, 0.0  ;;  %v3197_v19 = vrot.slane %v3103_v9, %v2069_v16  ;;  %v2088_v23 = vsub.s32 6, %v3114_v15 }
 0x117   :  { %v380_v27 = vrot.slane %v195_v25, %v3123_v21  ;;  %v368_v28 = vsel %vm121_vm1, %v281_v26, -inf  ;;  %v373_v38 = vcombine.high %v195_v25, %v195_v25 }
 0x118   :  { %369 = vmax.xlane.f32.xlu0 %v368_v28 }
 0x119   :  { %v388_v29 = vcombine.high %v380_v27, %v380_v27  ;;  %v396_v34 = vrot.slane %v380_v27, %v3123_v21  ;;  %v387_v39 = vrot.slane %v373_v38, %v3123_v21  ;;  %v3207_v27 = vrot.slane %v3103_v9, %v2088_v23 }
 0x11b   :  { %v410_v30 = vrot.slane %v388_v29, %v3123_v21  ;;  %v418_v37 = vcombine.high %v396_v34, %v396_v34  ;;  %v403_v40 = vrot.slane %v387_v39, %v3123_v21  ;;  %v389_v42 = vcombine.high %v387_v39, %v387_v39  ;;  %v363_v39 = vpop.f32.mrf.mxu0 }
 0x11d   :  { %613 = vxpose.xlu1.b32.start.end [1/1] (short) (narrow) %v410_v30, 32  ;;  %v420_v41 = vcombine.high %v410_v30, %v410_v30  ;;  %v417_v43 = vrot.slane %v389_v42, %v3123_v21  ;;  %v419_v47 = vcombine.high %v403_v40, %v403_v40 }
 0x11f   :  { %v421_v44 = vcombine.high %v417_v43, %v417_v43 }
 0x12a   :  { %744 = vxpose.xlu1.b32.start.end [1/1] (short) (narrow) %v418_v37, 32 }
 0x137   :  { %1006 = vxpose.xlu1.b32.start.end [1/1] (short) (narrow) %v403_v40, 32  ;;  %v2643_v40 = vpop.f32.mrf.mxu0 }
 0x144   :  { %875 = vxpose.xlu1.b32.start.end [1/1] (short) (narrow) %v420_v41, 32 }
 0x145   :  { %480 = vxpose.xlu0.b32.start.end [1/1] (short) (narrow) %v396_v34, 32 }
 0x151   :  { %1137 = vxpose.xlu1.b32.start.end [1/1] (short) (narrow) %v417_v43, 32  ;;  %v2107_v43 = vsub.s32 7, %v3114_v15 }
 0x15e   :  { %1399 = vxpose.xlu1.b32.start.end [1/1] (short) (narrow) %v421_v44, 32  ;;  %v2108_v44 = vrot.slane %v3103_v9, %v2107_v43 }
 0x17a   :  { %1977 = vbcast.lane.b32.xlu0 %v3141_v46, 256 }
 0x188   :  { %1981 = vbcast.lane.b32.xlu1 %v3141_v46, 264 }
 0x18c   :  { %1985 = vbcast.lane.b32.xlu1 %v3141_v46, 272 }
 0x190   :  { %1996 = vbcast.lane.b32.xlu1 %v3151_v54, 256 }
 0x194   :  { %2004 = vbcast.lane.b32.xlu1 %v3151_v54, 272 }
 0x198   :  { %1268 = vxpose.xlu0.b32.start.end [1/1] (short) (narrow) %v419_v47, 32  ;;  %2015 = vbcast.lane.b32.xlu1 %v3171_v1, 256 }
 0x199   :  { %v629_v48 = vpop.trf.xlu1 }
 0x19a   :  { %2654 = vmatprep.mubr.msk.f32.mxu0 %vm512_vm2, %v629_v48 }
 0x19c   :  { %2023 = vbcast.lane.b32.xlu1 %v3171_v1, 272 }
 0x19d   :  { %v630_v49 = vpop.trf.xlu1 }
 0x1a0   :  { %2034 = vbcast.lane.b32.xlu1 %v3185_v7, 256 }
 0x1a1   :  { %v370_v50 = vpop.xlane.xlu0 %369  ;;  %v3147_v51 = vpop.trf.xlu1 }
 0x1a2   :  { %v371_v53 = vsub.f32 %v281_v26, %v370_v50 }
 0x1a4   :  { %v431_v55 = vcombine.high %v371_v53, %v371_v53  ;;  %v438_v56 = vrot.slane %v371_v53, %v3123_v21  ;;  %2042 = vbcast.lane.b32.xlu1 %v3185_v7, 272 }
 0x1a5   :  { %v3154_v57 = vpop.trf.xlu1 }
 0x1a6   :  { %v3159_v59 = vrot.slane %v431_v55, %v3123_v21  ;;  %v446_v60 = vcombine.high %v438_v56, %v438_v56  ;;  %v454_v61 = vrot.slane %v438_v56, %v3123_v21  ;;  %v2514_v56 = vld [vmem:[%s3591_s8] ss:$0 sm:$0xff]  ;;  %s3015_s8 = smov [#allocation13]  }
 0x1a7   :  { %s2498_s18 = sshll.u32 %s3015_s8, 4  ;;  %s2499_s18 = int_to_ptr.vmem [resolvable:$true] %s2498_s18 }
 0x1a8   :  { %v447_v62 = vcombine.high %v3159_v59, %v3159_v59  ;;  %v468_v63 = vrot.slane %v446_v60, %v3123_v21  ;;  %2644 = vmatprep.subr.msk.mxu1 %vm525_vm3, %v454_v61  ;;  %2053 = vbcast.lane.b32.xlu1 %v3191_v12, 256  ;;  %v476_v24 = vcombine.high %v454_v61, %v454_v61  ;;  %s2973_s19 = scalar_lea.vmem %s2499_s18, 128  ;;  %p2978_p3 = scmp.lt.s32.totalorder %s2499_s18, %s2499_s18 }
 0x1a9   :  { %2645 = vmatpush3.msk.msra.mxu1 %vm525_vm3, %v454_v61  ;;  %v3167_v0 = vpop.trf.xlu1  ;;  %v461_v32 = vrot.slane %v3159_v59, %v3123_v21  ;;  %v364_v61 = vadd.f32 %v2514_v56, %v363_v39  ;;  %p2974_p2 = scmp.ne.s32.totalorder %s2499_s18, %s2973_s19  ;;  %p2979_p4 = scmp.lt.s32.totalorder %s2973_s19, %s2973_s19 }
 0x1aa   :  { %2652 = vmatprep.subr.msk.mxu0 %vm525_vm3, %v468_v63  ;;  %2708 = vmatprep.subr.msk.mxu1 %vm525_vm3, %v468_v63  ;;  %v478_v2 = vcombine.high %v468_v63, %v468_v63  ;;  %v475_v3 = vrot.slane %v447_v62, %v3123_v21 }
 0x1ab   :  { %2653 = vmatpush3.msk.msra.mxu0 %vm525_vm3, %v468_v63  ;;  %v477_v34 = vcombine.high %v461_v32, %v461_v32  ;;  %v3272_v62 = vmax.f32 %v364_v61, 0.0  ;;  %p2980_p5 = por %p2979_p4, %p2978_p3 }
 0x1ac   :  { %2655 = vmatmul.mubr.msk.f32.vlgmr.msra.gmra.mxu0 %vm512_vm2, %v630_v49  ;;  %2668 = vmatprep.subr.msk.mxu0 %vm525_vm3, %v478_v2  ;;  %v479_v30 = vcombine.high %v475_v3, %v475_v3 }
 0x1ad   :  { %2669 = vmatpush3.msk.msra.mxu0 %vm525_vm3, %v478_v2  ;;  %v761_v4 = vpop.trf.xlu1  ;;  %2061 = vbcast.lane.b32.xlu1 %v3191_v12, 272  ;;  %v1698_v2 = vrot.slane %v3272_v62, %v3123_v21  ;;  %p2981_p6 = pnand %p2980_p5, %p2974_p2 }
 0x1ae   :  { %2684 = vmatprep.subr.msk.mxu0 %vm525_vm3, %v475_v3 }
 0x1af   :  { %v3277_v5 = vrot.slane %v1698_v2, %v3123_v21 }
 0x1b1   :  { %v762_v6 = vpop.trf.xlu1  ;;  %2072 = vbcast.lane.b32.xlu1 %v3197_v19, 256  ;;  %v1743_v16 = vrot.slane %v3277_v5, %v3137_v45 }
 0x1b5   :  { %v763_v8 = vpop.trf.xlu1  ;;  %2080 = vbcast.lane.b32.xlu1 %v3197_v19, 272 }
 0x1b9   :  { %v1022_v11 = vpop.trf.xlu1  ;;  %2091 = vbcast.lane.b32.xlu1 %v3207_v27, 256 }
 0x1bd   :  { %v1023_v14 = vpop.trf.xlu1  ;;  %2099 = vbcast.lane.b32.xlu1 %v3207_v27, 272 }
 0x1c1   :  { %v496_v17 = vpop.trf.xlu0  ;;  %v1024_v18 = vpop.trf.xlu1  ;;  %2110 = vbcast.lane.b32.xlu1 %v2108_v44, 256 }
 0x1c2   :  { %2646 = vmatprep.mubr.msk.f32.mxu1 %vm512_vm2, %v496_v17 }
 0x1c5   :  { %v497_v20 = vpop.trf.xlu0  ;;  %v1025_v22 = vpop.trf.xlu1  ;;  %2118 = vbcast.lane.b32.xlu1 %v2108_v44, 272 }
 0x1c6   :  { %2647 = vmatmul.mubr.msk.f32.vlgmr.msra.gmra.mxu1 %vm512_vm2, %v497_v20 }
 0x1c7   :  { %2709 = vmatpush3.msk.msra.mxu1 %vm525_vm3, %v468_v63 }
 0x1c8   :  { %2660 = vmatprep.subr.msk.mxu1 %vm525_vm3, %v476_v24 }
 0x1c9   :  { %v498_v25 = vpop.trf.xlu0  ;;  %v891_v26 = vpop.trf.xlu1 }
 0x1ca   :  { %2649 = vmatprep.mubr.msk.f32.mxu1 %vm512_vm2, %v498_v25  ;;  %2670 = vmatprep.mubr.msk.f32.mxu0 %vm512_vm2, %v891_v26 }
 0x1cd   :  { %v499_v28 = vpop.trf.xlu0  ;;  %v892_v29 = vpop.trf.xlu1  ;;  %1989 = vbcast.lane.b32.xlu0 %v3141_v46, 280 }
 0x1ce   :  { %2650 = vmatmul.mubr.msk.f32.gmra.mxu1 %vm512_vm2, %v499_v28  ;;  %2671 = vmatmul.mubr.msk.f32.vlgmr.msra.gmra.mxu0 %vm512_vm2, %v892_v29 }
 0x1cf   :  { %2685 = vmatpush3.msk.msra.mxu0 %vm525_vm3, %v475_v3  ;;  %2657 = vmatprep.mubr.msk.f32.mxu1 %vm512_vm2, %v3147_v51 }
 0x1d0   :  { %2700 = vmatprep.subr.msk.mxu0 %vm525_vm3, %v479_v30 }
 0x1d1   :  { %v893_v31 = vpop.trf.xlu1  ;;  %2000 = vbcast.lane.b32.xlu0 %v3151_v54, 264 }
 0x1d2   :  { %2658 = vmatmul.mubr.msk.f32.vlgmr.msra.gmra.mxu1 %vm512_vm2, %v3154_v57  ;;  %2673 = vmatprep.mubr.msk.f32.mxu0 %vm512_vm2, %v893_v31 }
 0x1d3   :  { %2661 = vmatpush3.msk.msra.mxu1 %vm525_vm3, %v476_v24  ;;  %2662 = vmatprep.mubr.msk.f32.mxu1 %vm512_vm2, %v3167_v0 }
 0x1d4   :  { %2676 = vmatprep.subr.msk.mxu1 %vm525_vm3, %v461_v32 }
 0x1d5   :  { %v894_v33 = vpop.trf.xlu1  ;;  %2008 = vbcast.lane.b32.xlu0 %v3151_v54, 280 }
 0x1d6   :  { %2663 = vmatmul.mubr.msk.f32.vlgmr.msra.gmra.mxu1 %vm512_vm2, %v761_v4  ;;  %2674 = vmatmul.mubr.msk.f32.gmra.mxu0 %vm512_vm2, %v894_v33 }
 0x1d7   :  { %2677 = vmatpush3.msk.msra.mxu1 %vm525_vm3, %v461_v32  ;;  %2665 = vmatprep.mubr.msk.f32.mxu1 %vm512_vm2, %v762_v6 }
 0x1d8   :  { %2692 = vmatprep.subr.msk.mxu1 %vm525_vm3, %v477_v34 }
 0x1d9   :  { %v1153_v35 = vpop.trf.xlu1  ;;  %2019 = vbcast.lane.b32.xlu0 %v3171_v1, 264 }
 0x1da   :  { %2666 = vmatmul.mubr.msk.f32.gmra.mxu1 %vm512_vm2, %v763_v8  ;;  %2686 = vmatprep.mubr.msk.f32.mxu0 %vm512_vm2, %v1153_v35 }
 0x1db   :  { %2678 = vmatprep.mubr.msk.f32.mxu1 %vm512_vm2, %v1022_v11 }
 0x1dd   :  { %v1154_v36 = vpop.trf.xlu1  ;;  %2027 = vbcast.lane.b32.xlu0 %v3171_v1, 280 }
 0x1de   :  { %2679 = vmatmul.mubr.msk.f32.vlgmr.msra.gmra.mxu1 %vm512_vm2, %v1023_v14  ;;  %2687 = vmatmul.mubr.msk.f32.vlgmr.msra.gmra.mxu0 %vm512_vm2, %v1154_v36 }
 0x1df   :  { %2693 = vmatpush3.msk.msra.mxu1 %vm525_vm3, %v477_v34  ;;  %2701 = vmatpush3.msk.msra.mxu0 %vm525_vm3, %v479_v30 }
 0x1e0   :  { %2681 = vmatprep.mubr.msk.f32.mxu1 %vm512_vm2, %v1024_v18 }
 0x1e1   :  { %v1155_v37 = vpop.trf.xlu1  ;;  %2038 = vbcast.lane.b32.xlu0 %v3185_v7, 264 }
 0x1e2   :  { %2682 = vmatmul.mubr.msk.f32.gmra.mxu1 %vm512_vm2, %v1025_v22  ;;  %2689 = vmatprep.mubr.msk.f32.mxu0 %vm512_vm2, %v1155_v37 }
 0x1e5   :  { %v1156_v38 = vpop.trf.xlu1  ;;  %2046 = vbcast.lane.b32.xlu0 %v3185_v7, 280  ;;  %v1706_v7 = vcombine.high %v1698_v2, %v1698_v2 }
 0x1e6   :  { %2690 = vmatmul.mubr.msk.f32.gmra.mxu0 %vm512_vm2, %v1156_v38 }
 0x1e9   :  { %v1415_v41 = vpop.trf.xlu1  ;;  %2057 = vbcast.lane.b32.xlu0 %v3191_v12, 264 }
 0x1ea   :  { %2702 = vmatprep.mubr.msk.f32.mxu0 %vm512_vm2, %v1415_v41 }
 0x1ec   :  { %v3263_v48 = vpop.permute.xlu0 %1977 }
 0x1ed   :  { %v1416_v42 = vpop.trf.xlu1  ;;  %2065 = vbcast.lane.b32.xlu0 %v3191_v12, 280 }
 0x1ee   :  { %2703 = vmatmul.mubr.msk.f32.vlgmr.msra.gmra.mxu0 %vm512_vm2, %v1416_v42 }
 0x1f1   :  { %v1417_v46 = vpop.trf.xlu1  ;;  %2076 = vbcast.lane.b32.xlu0 %v3197_v19, 264 }
 0x1f2   :  { %2705 = vmatprep.mubr.msk.f32.mxu0 %vm512_vm2, %v1417_v46 }
 0x1f5   :  { %v1418_v47 = vpop.trf.xlu1  ;;  %2084 = vbcast.lane.b32.xlu0 %v3197_v19, 280  ;;  %v1728_v19 = vrot.slane %v1706_v7, %v3123_v21 }
 0x1f6   :  { %2706 = vmatmul.mubr.msk.f32.gmra.mxu0 %vm512_vm2, %v1418_v47 }
 0x1f7   :  { %v3287_v28 = vrot.slane %v1728_v19, %v3137_v45 }
 0x1f9   :  { %2095 = vbcast.lane.b32.xlu0 %v3207_v27, 264 }
 0x1fd   :  { %2103 = vbcast.lane.b32.xlu0 %v3207_v27, 280 }
 0x201   :  { %2114 = vbcast.lane.b32.xlu0 %v2108_v44, 264 }
 0x205   :  { %2122 = vbcast.lane.b32.xlu0 %v2108_v44, 280 }
 0x214   :  { %v1284_v9 = vpop.trf.xlu0 }
 0x215   :  { %2694 = vmatprep.mubr.msk.f32.mxu1 %vm512_vm2, %v1284_v9 }
 0x218   :  { %v1285_v49 = vpop.trf.xlu0 }
 0x219   :  { %2695 = vmatmul.mubr.msk.f32.vlgmr.msra.gmra.mxu1 %vm512_vm2, %v1285_v49 }
 0x21c   :  { %v1286_v50 = vpop.trf.xlu0 }
 0x21d   :  { %2697 = vmatprep.mubr.msk.f32.mxu1 %vm512_vm2, %v1286_v50 }
 0x220   :  { %v1287_v51 = vpop.trf.xlu0 }
 0x221   :  { %2698 = vmatmul.mubr.msk.f32.gmra.mxu1 %vm512_vm2, %v1287_v51  ;;  %v1738_v51 = vcombine.high %v1728_v19, %v1728_v19 }
 0x26c   :  { %v2656_v52 = vpop.f32.mrf.mxu0 }
 0x26d   :  { %v1540_v53 = vmul.f32 1.442695, %v2656_v52 }
 0x26e   :  { %v725_v54 = vpop.f32.mrf.mxu0 }
 0x26f   :  { %v1538_v59 = vmul.f32 1.442695, %v725_v54 }
 0x286   :  { %v2648_v55 = vpop.f32.mrf.mxu1 }
 0x287   :  { %v1532_v57 = vmul.f32 1.442695, %v2648_v55 }
 0x288   :  { %v594_v58 = vpop.f32.mrf.mxu1 }
 0x289   :  { %2725 = vpow2.f32 %v1532_v57  ;;  %v1530_v60 = vmul.f32 1.442695, %v594_v58 }
 0x28a   :  { %2727 = vpow2.f32 %v1540_v53 }
 0x28b   :  { %2729 = vpow2.f32 %v1530_v60  ;;  %v1755_v60 = vrot.slane %v1738_v51, %v3137_v45 }
 0x28c   :  { %2731 = vpow2.f32 %v1538_v59 }
 0x28e   :  { %v2651_v63 = vpop.f32.mrf.mxu1  ;;  %v2672_v4 = vpop.f32.mrf.mxu0 }
 0x28f   :  { %v1536_v0 = vmul.f32 1.442695, %v2651_v63  ;;  %v1556_v10 = vmul.f32 1.442695, %v2672_v4  ;;  %v3014_v4 = vmov 0  }
 0x290   :  { %v604_v1 = vpop.f32.mrf.mxu1  ;;  %v987_v14 = vpop.f32.mrf.mxu0  ;;  %2724 = vset.pattern.permute.xlu1 %v3014_v4  ;;  %2723 = vset.pattern.permute.xlu0 %v3014_v4 }
 0x291   :  { %2733 = vpow2.f32 %v1536_v0  ;;  %v1534_v3 = vmul.f32 1.442695, %v604_v1  ;;  %v1554_v22 = vmul.f32 1.442695, %v987_v14 }
 0x292   :  { %v2659_v20 = vpop.f32.mrf.mxu1 }
 0x293   :  { %2735 = vpow2.f32 %v1534_v3  ;;  %v1544_v29 = vmul.f32 1.442695, %v2659_v20 }
 0x294   :  { %2737 = vpow2.f32 %v1556_v10  ;;  %v735_v27 = vpop.f32.mrf.mxu1 }
 0x295   :  { %2739 = vpow2.f32 %v1554_v22  ;;  %v1542_v32 = vmul.f32 1.442695, %v735_v27 }
 0x296   :  { %v2726_v6 = vpop.eup %2725  ;;  %2741 = vpow2.f32 %v1544_v29  ;;  %v2675_v37 = vpop.f32.mrf.mxu0 }
 0x297   :  { %v2728_v8 = vpop.eup %2727  ;;  %v1597_v11 = vsel %vm121_vm1, %v2726_v6, 0.0  ;;  %v1781_v24 = vmul.f32 %v2726_v6, %v1743_v16  ;;  %2743 = vpow2.f32 %v1542_v32  ;;  %v1560_v40 = vmul.f32 1.442695, %v2675_v37  ;;  %v2664_v47 = vpop.f32.mrf.mxu1 }
 0x298   :  { %v2730_v12 = vpop.eup %2729  ;;  %1598 = vadd.xlane.f32.xlu1 %v1597_v11  ;;  %v1609_v23 = vsel %vm121_vm1, %v2728_v8, 0.0  ;;  %v1785_v35 = vmul.f32 %v2728_v8, %v3287_v28  ;;  %v997_v43 = vpop.f32.mrf.mxu0  ;;  %v1548_v55 = vmul.f32 1.442695, %v2664_v47 }
 0x299   :  { %v1594_v17 = vsel %vm121_vm1, %v2730_v12, 0.0  ;;  %v2732_v18 = vpop.eup %2731  ;;  %v1780_v26 = vmul.f32 %v2730_v12, %v1743_v16  ;;  %v1815_v30 = vsel %vm121_vm1, %v1781_v24, 0.0  ;;  %2745 = vpow2.f32 %v1560_v40  ;;  %v856_v54 = vpop.f32.mrf.mxu1 }
 0x29a   :  { %1595 = vadd.xlane.f32.xlu0 %v1594_v17  ;;  %v1606_v25 = vsel %vm121_vm1, %v2732_v18, 0.0  ;;  %v1784_v39 = vmul.f32 %v2732_v18, %v3287_v28  ;;  %v1827_v41 = vsel %vm121_vm1, %v1785_v35, 0.0  ;;  %v1558_v9 = vmul.f32 1.442695, %v997_v43 }
 0x29b   :  { %v1812_v33 = vsel %vm121_vm1, %v1780_v26, 0.0  ;;  %v1546_v58 = vmul.f32 1.442695, %v856_v54  ;;  %v2667_v14 = vpop.f32.mrf.mxu1  ;;  %v1691_v26 = vcombine.high %v3272_v62, %v3272_v62  ;;  %v1736_v62 = vcombine.high %v3277_v5, %v3277_v5 }
 0x29c   :  { %1610 = vadd.xlane.f32.xlu1 %v1609_v23  ;;  %v1824_v44 = vsel %vm121_vm1, %v1784_v39, 0.0  ;;  %2747 = vpow2.f32 %v1558_v9  ;;  %v1552_v23 = vmul.f32 1.442695, %v2667_v14  ;;  %v3331_v9 = vpop.permute.xlu0 %1989 }
 0x29d   :  { %2749 = vpow2.f32 %v1548_v55  ;;  %v866_v22 = vpop.f32.mrf.mxu1 }
 0x29e   :  { %1607 = vadd.xlane.f32.xlu0 %v1606_v25  ;;  %v2734_v31 = vpop.eup %2733  ;;  %v2688_v1 = vpop.f32.mrf.mxu0  ;;  %2751 = vpow2.f32 %v1546_v58  ;;  %v1550_v27 = vmul.f32 1.442695, %v866_v22 }
 0x29f   :  { %v1603_v34 = vsel %vm121_vm1, %v2734_v31, 0.0  ;;  %v1783_v49 = vmul.f32 %v2734_v31, %v1743_v16  ;;  %v1572_v6 = vmul.f32 1.442695, %v2688_v1  ;;  %v3314_v31 = vpop.permute.xlu1 %1981 }
 0x2a0   :  { %1816 = vadd.xlane.f32.xlu1 %v1815_v30  ;;  %v2736_v36 = vpop.eup %2735  ;;  %v1249_v10 = vpop.f32.mrf.mxu0 }
 0x2a1   :  { %v1600_v38 = vsel %vm121_vm1, %v2736_v36, 0.0  ;;  %v2738_v42 = vpop.eup %2737  ;;  %v1782_v53 = vmul.f32 %v2736_v36, %v1743_v16  ;;  %v1821_v56 = vsel %vm121_vm1, %v1783_v49, 0.0  ;;  %2753 = vpow2.f32 %v1572_v6 }
 0x2a2   :  { %1813 = vadd.xlane.f32.xlu0 %v1812_v33  ;;  %v1633_v46 = vsel %vm121_vm1, %v2738_v42, 0.0  ;;  %v2740_v50 = vpop.eup %2739  ;;  %v1793_v0 = vmul.f32 %v2738_v42, %v1755_v60  ;;  %v1570_v16 = vmul.f32 1.442695, %v1249_v10  ;;  %v3318_v33 = vrot.slane %v1691_v26, %v3123_v21 }
 0x2a3   :  { %v1630_v52 = vsel %vm121_vm1, %v2740_v50, 0.0  ;;  %v2742_v57 = vpop.eup %2741  ;;  %v1818_v59 = vsel %vm121_vm1, %v1782_v53, 0.0  ;;  %v1792_v3 = vmul.f32 %v2740_v50, %v1755_v60  ;;  %v1751_v42 = vrot.slane %v1736_v62, %v3137_v45  ;;  %v3327_v43 = vpop.permute.xlu1 %1985 }
 0x2a4   :  { %1604 = vadd.xlane.f32.xlu1 %v1603_v34  ;;  %v2744_v61 = vpop.eup %2743  ;;  %v1615_v63 = vsel %vm121_vm1, %v2742_v57, 0.0  ;;  %v1851_v7 = vsel %vm121_vm1, %v1793_v0, 0.0  ;;  %v1787_v17 = vmul.f32 %v2742_v57, %v3287_v28  ;;  %2755 = vpow2.f32 %v1570_v16 }
 0x2a5   :  { %v1612_v2 = vsel %vm121_vm1, %v2744_v61, 0.0  ;;  %v1848_v11 = vsel %vm121_vm1, %v1792_v3, 0.0  ;;  %v1786_v20 = vmul.f32 %v2744_v61, %v3287_v28  ;;  %2757 = vpow2.f32 %v1552_v23  ;;  %v3342_v61 = vpop.permute.xlu0 %2000 }
 0x2a6   :  { %1601 = vadd.xlane.f32.xlu0 %v1600_v38  ;;  %v2746_v8 = vpop.eup %2745  ;;  %v1833_v24 = vsel %vm121_vm1, %v1787_v17, 0.0  ;;  %v2691_v34 = vpop.f32.mrf.mxu0  ;;  %2759 = vpow2.f32 %v1550_v27 }
 0x2a7   :  { %v1639_v12 = vsel %vm121_vm1, %v2746_v8, 0.0  ;;  %v1830_v29 = vsel %vm121_vm1, %v1786_v20, 0.0  ;;  %v1795_v32 = vmul.f32 %v2746_v8, %v1755_v60  ;;  %v1576_v37 = vmul.f32 1.442695, %v2691_v34 }
 0x2a8   :  { %1828 = vadd.xlane.f32.xlu1 %v1827_v41  ;;  %v1259_v40 = vpop.f32.mrf.mxu0  ;;  %v1707_v41 = vcombine.high %v3318_v33, %v3318_v33 }
 0x2a9   :  { %v2748_v18 = vpop.eup %2747  ;;  %v1857_v38 = vsel %vm121_vm1, %v1795_v32, 0.0  ;;  %2761 = vpow2.f32 %v1576_v37  ;;  %v1574_v47 = vmul.f32 1.442695, %v1259_v40  ;;  %v3349_v10 = vpop.permute.xlu0 %2008  ;;  %v3368_v40 = vrot.slane %v3318_v33, %v3123_v21 }
 0x2aa   :  { %1825 = vadd.xlane.f32.xlu0 %v1824_v44  ;;  %v1636_v19 = vsel %vm121_vm1, %v2748_v18, 0.0  ;;  %v2750_v25 = vpop.eup %2749  ;;  %v1794_v36 = vmul.f32 %v2748_v18, %v1755_v60  ;;  %v3334_v51 = vrot.slane %v1707_v41, %v3123_v21 }
 0x2ab   :  { %v2752_v30 = vpop.eup %2751  ;;  %v1621_v28 = vsel %vm121_vm1, %v2750_v25, 0.0  ;;  %v1789_v49 = vmul.f32 %v2750_v25, %v1751_v42  ;;  %2763 = vpow2.f32 %v1574_v47 }
 0x2ac   :  { %1634 = vadd.xlane.f32.xlu1 %v1633_v46  ;;  %v1618_v35 = vsel %vm121_vm1, %v2752_v30, 0.0  ;;  %v1854_v5 = vsel %vm121_vm1, %v1794_v36, 0.0  ;;  %v2680_v46 = vpop.f32.mrf.mxu1  ;;  %v1788_v53 = vmul.f32 %v2752_v30, %v1751_v42 }
 0x2ad   :  { %v1564_v55 = vmul.f32 1.442695, %v2680_v46  ;;  %v1839_v57 = vsel %vm121_vm1, %v1789_v49, 0.0 }
 0x2ae   :  { %1631 = vadd.xlane.f32.xlu0 %v1630_v52  ;;  %v2754_v39 = vpop.eup %2753  ;;  %v1118_v54 = vpop.f32.mrf.mxu1 }
 0x2af   :  { %v1657_v44 = vsel %vm121_vm1, %v2754_v39, 0.0  ;;  %v1562_v60 = vmul.f32 1.442695, %v1118_v54  ;;  %2765 = vpow2.f32 %v1564_v55  ;;  %v2704_v3 = vpop.f32.mrf.mxu0 }
 0x2b0   :  { %1822 = vadd.xlane.f32.xlu1 %v1821_v56  ;;  %v3337_v56 = vpop.permute.xlu1 %1996  ;;  %v1588_v8 = vmul.f32 1.442695, %v2704_v3  ;;  %v2683_v18 = vpop.f32.mrf.mxu1 }
 0x2b1   :  { %v2756_v50 = vpop.eup %2755  ;;  %2767 = vpow2.f32 %v1562_v60  ;;  %v1511_v14 = vpop.f32.mrf.mxu0 }
 0x2b2   :  { %1819 = vadd.xlane.f32.xlu0 %v1818_v59  ;;  %v1654_v52 = vsel %vm121_vm1, %v2756_v50, 0.0  ;;  %v2758_v58 = vpop.eup %2757  ;;  %v1763_v59 = vrot.slane %v3334_v51, %v3137_v45  ;;  %2769 = vpow2.f32 %v1588_v8  ;;  %v1128_v27 = vpop.f32.mrf.mxu1 }
 0x2b3   :  { %v2760_v0 = vpop.eup %2759  ;;  %v1627_v1 = vsel %vm121_vm1, %v2758_v58, 0.0  ;;  %v1791_v22 = vmul.f32 %v2758_v58, %v1751_v42  ;;  %v1566_v32 = vmul.f32 1.442695, %v1128_v27  ;;  %v1739_v58 = vcombine.high %v3334_v51, %v3334_v51 }
 0x2b4   :  { %1616 = vadd.xlane.f32.xlu1 %v1615_v63  ;;  %v1836_v63 = vsel %vm121_vm1, %v1788_v53, 0.0  ;;  %v3346_v4 = vpop.permute.xlu1 %2004  ;;  %v1624_v6 = vsel %vm121_vm1, %v2760_v0, 0.0  ;;  %v1790_v26 = vmul.f32 %v2760_v0, %v1751_v42 }
 0x2b5   :  { %v1845_v30 = vsel %vm121_vm1, %v1791_v22, 0.0  ;;  %v1771_v8 = vrot.slane %v1739_v58, %v3137_v45 }
 0x2b6   :  { %1613 = vadd.xlane.f32.xlu0 %v1612_v2  ;;  %v1801_v2 = vmul.f32 %v2754_v39, %v1763_v59  ;;  %v1842_v62 = vsel %vm121_vm1, %v1790_v26, 0.0  ;;  %v2707_v39 = vpop.f32.mrf.mxu0 }
 0x2b8   :  { %1852 = vadd.xlane.f32.xlu1 %v1851_v7  ;;  %v1800_v7 = vmul.f32 %v2756_v50, %v1763_v59  ;;  %v3354_v20 = vpop.permute.xlu1 %2015  ;;  %v1521_v49 = vpop.f32.mrf.mxu0  ;;  %v1759_v50 = vrot.slane %v3368_v40, %v3137_v45 }
 0x2b9   :  { %v1590_v53 = vmul.f32 1.442695, %v1521_v49 }
 0x2ba   :  { %1849 = vadd.xlane.f32.xlu0 %v1848_v11  ;;  %v1875_v11 = vsel %vm121_vm1, %v1801_v2, 0.0  ;;  %v1872_v16 = vsel %vm121_vm1, %v1800_v7, 0.0 }
 0x2bc   :  { %1640 = vadd.xlane.f32.xlu1 %v1639_v12  ;;  %v2762_v12 = vpop.eup %2761  ;;  %v3360_v34 = vpop.permute.xlu1 %2023 }
 0x2bd   :  { %v1663_v17 = vsel %vm121_vm1, %v2762_v12, 0.0  ;;  %v2764_v23 = vpop.eup %2763 }
 0x2be   :  { %1637 = vadd.xlane.f32.xlu0 %v1636_v19  ;;  %v1586_v19 = vmul.f32 1.442695, %v1511_v14  ;;  %v1660_v25 = vsel %vm121_vm1, %v2764_v23, 0.0  ;;  %v1802_v42 = vmul.f32 %v2764_v23, %v1763_v59 }
 0x2c0   :  { %1834 = vadd.xlane.f32.xlu1 %v1833_v24  ;;  %v3356_v24 = vpop.permute.xlu0 %2019  ;;  %2771 = vpow2.f32 %v1586_v19  ;;  %v1878_v21 = vsel %vm121_vm1, %v1802_v42, 0.0 }
 0x2c2   :  { %1831 = vadd.xlane.f32.xlu0 %v1830_v29  ;;  %v1568_v29 = vmul.f32 1.442695, %v2683_v18 }
 0x2c4   :  { %1622 = vadd.xlane.f32.xlu1 %v1621_v28  ;;  %v2766_v28 = vpop.eup %2765  ;;  %2773 = vpow2.f32 %v1568_v29  ;;  %v3363_v36 = vpop.permute.xlu0 %2027 }
 0x2c5   :  { %v1645_v37 = vsel %vm121_vm1, %v2766_v28, 0.0  ;;  %2775 = vpow2.f32 %v1566_v32  ;;  %v1797_v54 = vmul.f32 %v2766_v28, %v1759_v50 }
 0x2c6   :  { %1619 = vadd.xlane.f32.xlu0 %v1618_v35  ;;  %v2768_v35 = vpop.eup %2767 }
 0x2c7   :  { %v1642_v41 = vsel %vm121_vm1, %v2768_v35, 0.0  ;;  %v2770_v47 = vpop.eup %2769  ;;  %v1863_v2 = vsel %vm121_vm1, %v1797_v54, 0.0 }
 0x2c8   :  { %1858 = vadd.xlane.f32.xlu1 %v1857_v38  ;;  %v1803_v38 = vmul.f32 %v2762_v12, %v1763_v59  ;;  %v1681_v33 = vsel %vm121_vm1, %v2770_v47, 0.0 }
 0x2ca   :  { %1855 = vadd.xlane.f32.xlu0 %v1854_v5  ;;  %v1592_v5 = vmul.f32 1.442695, %v2707_v39  ;;  %v1881_v46 = vsel %vm121_vm1, %v1803_v38, 0.0 }
 0x2cc   :  { %1658 = vadd.xlane.f32.xlu1 %v1657_v44  ;;  %v3371_v44 = vpop.permute.xlu1 %2034  ;;  %2777 = vpow2.f32 %v1592_v5 }
 0x2cd   :  { %v2772_v55 = vpop.eup %2771  ;;  %2779 = vpow2.f32 %v1590_v53 }
 0x2ce   :  { %1655 = vadd.xlane.f32.xlu0 %v1654_v52  ;;  %v3376_v52 = vpop.permute.xlu0 %2038  ;;  %v1678_v60 = vsel %vm121_vm1, %v2772_v55, 0.0  ;;  %v1808_v19 = vmul.f32 %v2772_v55, %v1771_v8 }
 0x2d0   :  { %1840 = vadd.xlane.f32.xlu1 %v1839_v57  ;;  %v3382_v59 = vpop.permute.xlu1 %2042  ;;  %v1896_v27 = vsel %vm121_vm1, %v1808_v19, 0.0 }
 0x2d1   :  { %v2774_v3 = vpop.eup %2773 }
 0x2d2   :  { %1837 = vadd.xlane.f32.xlu0 %v1836_v63  ;;  %v1796_v63 = vmul.f32 %v2768_v35, %v1759_v50  ;;  %v3385_v0 = vpop.permute.xlu0 %2046  ;;  %v2776_v51 = vpop.eup %2775  ;;  %v1651_v14 = vsel %vm121_vm1, %v2774_v3, 0.0 }
 0x2d3   :  { %v1648_v18 = vsel %vm121_vm1, %v2776_v51, 0.0  ;;  %v1798_v39 = vmul.f32 %v2776_v51, %v1759_v50 }
 0x2d4   :  { %1628 = vadd.xlane.f32.xlu1 %v1627_v1  ;;  %v1860_v7 = vsel %vm121_vm1, %v1796_v63, 0.0 }
 0x2d5   :  { %v1866_v49 = vsel %vm121_vm1, %v1798_v39, 0.0 }
 0x2d6   :  { %1625 = vadd.xlane.f32.xlu0 %v1624_v6 }
 0x2d8   :  { %1876 = vadd.xlane.f32.xlu1 %v1875_v11  ;;  %v3390_v11 = vpop.permute.xlu1 %2053 }
 0x2d9   :  { %v2696_v57 = vpop.f32.mrf.mxu1 }
 0x2da   :  { %1873 = vadd.xlane.f32.xlu0 %v1872_v16  ;;  %v1580_v1 = vmul.f32 1.442695, %v2696_v57  ;;  %v1809_v16 = vmul.f32 %v2770_v47, %v1771_v8 }
 0x2db   :  { %v1380_v6 = vpop.f32.mrf.mxu1 }
 0x2dc   :  { %1664 = vadd.xlane.f32.xlu1 %v1663_v17  ;;  %2781 = vpow2.f32 %v1580_v1  ;;  %v1578_v12 = vmul.f32 1.442695, %v1380_v6  ;;  %v3393_v17 = vpop.permute.xlu0 %2057  ;;  %v1899_v23 = vsel %vm121_vm1, %v1809_v16, 0.0  ;;  %v3397_v26 = vpop.permute.xlu1 %2061 }
 0x2de   :  { %1661 = vadd.xlane.f32.xlu0 %v1660_v25  ;;  %2783 = vpow2.f32 %v1578_v12  ;;  %v2778_v25 = vpop.eup %2777 }
 0x2df   :  { %v1687_v29 = vsel %vm121_vm1, %v2778_v25, 0.0  ;;  %v2780_v35 = vpop.eup %2779 }
 0x2e0   :  { %1846 = vadd.xlane.f32.xlu1 %v1845_v30  ;;  %v3401_v28 = vpop.permute.xlu0 %2065  ;;  %v1684_v38 = vsel %vm121_vm1, %v2780_v35, 0.0  ;;  %v1810_v57 = vmul.f32 %v2780_v35, %v1771_v8 }
 0x2e1   :  { %v2699_v22 = vpop.f32.mrf.mxu1 }
 0x2e2   :  { %1843 = vadd.xlane.f32.xlu0 %v1842_v62  ;;  %v1584_v32 = vmul.f32 1.442695, %v2699_v22  ;;  %v1799_v62 = vmul.f32 %v2774_v3, %v1759_v50  ;;  %v1811_v50 = vmul.f32 %v2778_v25, %v1771_v8  ;;  %v1902_v63 = vsel %vm121_vm1, %v1810_v57, 0.0 }
 0x2e3   :  { %v1390_v30 = vpop.f32.mrf.mxu1 }
 0x2e4   :  { %1646 = vadd.xlane.f32.xlu1 %v1645_v37  ;;  %v1582_v37 = vmul.f32 1.442695, %v1390_v30  ;;  %2785 = vpow2.f32 %v1584_v32  ;;  %v1869_v42 = vsel %vm121_vm1, %v1799_v62, 0.0  ;;  %v3409_v47 = vpop.permute.xlu0 %2076  ;;  %v1905_v58 = vsel %vm121_vm1, %v1811_v50, 0.0 }
 0x2e6   :  { %1643 = vadd.xlane.f32.xlu0 %v1642_v41  ;;  %v3404_v41 = vpop.permute.xlu1 %2072  ;;  %2787 = vpow2.f32 %v1582_v37 }
 0x2e8   :  { %1882 = vadd.xlane.f32.xlu1 %v1881_v46  ;;  %v1737_v46 = vcombine.high %v3368_v40, %v3368_v40  ;;  %v3417_v40 = vpop.permute.xlu0 %2084 }
 0x2e9   :  { %v2782_v5 = vpop.eup %2781 }
 0x2ea   :  { %1879 = vadd.xlane.f32.xlu0 %v1878_v21  ;;  %v1669_v21 = vsel %vm121_vm1, %v2782_v5, 0.0  ;;  %v1767_v53 = vrot.slane %v1737_v46, %v3137_v45  ;;  %v3414_v54 = vpop.permute.xlu1 %2080 }
 0x2ec   :  { %1682 = vadd.xlane.f32.xlu1 %v1681_v33  ;;  %v2784_v33 = vpop.eup %2783  ;;  %v3424_v6 = vpop.permute.xlu0 %2095 }
 0x2ed   :  { %v1666_v55 = vsel %vm121_vm1, %v2784_v33, 0.0  ;;  %v1804_v1 = vmul.f32 %v2784_v33, %v1767_v53 }
 0x2ee   :  { %1679 = vadd.xlane.f32.xlu0 %v1678_v60  ;;  %v1805_v60 = vmul.f32 %v2782_v5, %v1767_v53 }
 0x2f0   :  { %1864 = vadd.xlane.f32.xlu1 %v1863_v2  ;;  %v3421_v2 = vpop.permute.xlu1 %2091  ;;  %v1887_v45 = vsel %vm121_vm1, %v1805_v60, 0.0  ;;  %v3431_v19 = vpop.permute.xlu0 %2103 }
 0x2f1   :  { %v2786_v3 = vpop.eup %2785 }
 0x2f2   :  { %1861 = vadd.xlane.f32.xlu0 %v1860_v7  ;;  %v1884_v7 = vsel %vm121_vm1, %v1804_v1, 0.0  ;;  %v1675_v8 = vsel %vm121_vm1, %v2786_v3, 0.0  ;;  %v1807_v12 = vmul.f32 %v2786_v3, %v1767_v53 }
 0x2f3   :  { %v2788_v51 = vpop.eup %2787 }
 0x2f4   :  { %1652 = vadd.xlane.f32.xlu1 %v1651_v14  ;;  %v3428_v14 = vpop.permute.xlu1 %2099  ;;  %v1672_v16 = vsel %vm121_vm1, %v2788_v51, 0.0  ;;  %v1893_v22 = vsel %vm121_vm1, %v1807_v12, 0.0 }
 0x2f6   :  { %1649 = vadd.xlane.f32.xlu0 %v1648_v18  ;;  %v1806_v18 = vmul.f32 %v2788_v51, %v1767_v53 }
 0x2f8   :  { %1900 = vadd.xlane.f32.xlu1 %v1899_v23  ;;  %v1890_v23 = vsel %vm121_vm1, %v1806_v18, 0.0  ;;  %v3435_v25 = vpop.permute.xlu1 %2110 }
 0x2fa   :  { %1897 = vadd.xlane.f32.xlu0 %v1896_v27  ;;  %v3437_v27 = vpop.permute.xlu0 %2114 }
 0x2fc   :  { %1688 = vadd.xlane.f32.xlu1 %v1687_v29  ;;  %v3439_v29 = vpop.permute.xlu1 %2118 }
 0x2fe   :  { %1685 = vadd.xlane.f32.xlu0 %v1684_v38  ;;  %v3441_v30 = vpop.permute.xlu0 %2122 }
 0x300   :  { %1870 = vadd.xlane.f32.xlu1 %v1869_v42 }
 0x302   :  { %1867 = vadd.xlane.f32.xlu0 %v1866_v49 }
 0x304   :  { %1670 = vadd.xlane.f32.xlu1 %v1669_v21 }
 0x306   :  { %1667 = vadd.xlane.f32.xlu0 %v1666_v55 }
 0x308   :  { %1906 = vadd.xlane.f32.xlu1 %v1905_v58 }
 0x30a   :  { %1903 = vadd.xlane.f32.xlu0 %v1902_v63 }
 0x30c   :  { %1888 = vadd.xlane.f32.xlu1 %v1887_v45 }
 0x30e   :  { %1885 = vadd.xlane.f32.xlu0 %v1884_v7 }
 0x310   :  { %1676 = vadd.xlane.f32.xlu1 %v1675_v8 }
 0x312   :  { %1673 = vadd.xlane.f32.xlu0 %v1672_v16 }
 0x314   :  { %1894 = vadd.xlane.f32.xlu1 %v1893_v22 }
 0x316   :  { %1891 = vadd.xlane.f32.xlu0 %v1890_v23 }
 0x321   :  { %v1599_v32 = vpop.xlane.xlu1 %1598 }
 0x322   :  { %2789 = vrcp.f32 %v1599_v32 }
 0x323   :  { %v1596_v62 = vpop.xlane.xlu0 %1595 }
 0x324   :  { %2791 = vrcp.f32 %v1596_v62 }
 0x325   :  { %v1611_v35 = vpop.xlane.xlu1 %1610 }
 0x326   :  { %2793 = vrcp.f32 %v1611_v35 }
 0x327   :  { %v1608_v37 = vpop.xlane.xlu0 %1607 }
 0x328   :  { %2795 = vrcp.f32 %v1608_v37 }
 0x329   :  { %v1817_v38 = vpop.xlane.xlu1 %1816 }
 0x32b   :  { %v1814_v39 = vpop.xlane.xlu0 %1813 }
 0x32d   :  { %v1605_v42 = vpop.xlane.xlu1 %1604 }
 0x32e   :  { %2797 = vrcp.f32 %v1605_v42 }
 0x32f   :  { %v2790_v5 = vpop.eup %2789  ;;  %v1602_v46 = vpop.xlane.xlu0 %1601 }
 0x330   :  { %v1941_v49 = vmul.f32 %v2790_v5, %v1817_v38  ;;  %2799 = vrcp.f32 %v1602_v46 }
 0x331   :  { %v2792_v21 = vpop.eup %2791  ;;  %v1829_v50 = vpop.xlane.xlu1 %1828 }
 0x332   :  { %v2157_v33 = vadd.f32 %v3314_v31, %v1941_v49  ;;  %v1940_v53 = vmul.f32 %v2792_v21, %v1814_v39 }
 0x333   :  { %v2794_v55 = vpop.eup %2793  ;;  %v1826_v57 = vpop.xlane.xlu0 %1825 }
 0x334   :  { %v2156_v58 = vadd.f32 %v3263_v48, %v1940_v53  ;;  %v1945_v60 = vmul.f32 %v2794_v55, %v1829_v50  ;;  %2224 = vperm.xlu0 %2723, %v2157_v33  }
 0x335   :  { %v2796_v63 = vpop.eup %2795  ;;  %v1635_v1 = vpop.xlane.xlu1 %1634 }
 0x336   :  { %v1944_v45 = vmul.f32 %v2796_v63, %v1826_v57  ;;  %2801 = vrcp.f32 %v1635_v1  ;;  %2221 = vperm.xlu1 %2724, %v2156_v58   ;;  %v2161_v7 = vadd.f32 %v3342_v61, %v1945_v60 }
 0x337   :  { %v1632_v3 = vpop.xlane.xlu0 %1631 }
 0x338   :  { %v2160_v8 = vadd.f32 %v3337_v56, %v1944_v45  ;;  %2803 = vrcp.f32 %v1632_v3 }
 0x339   :  { %v1823_v51 = vpop.xlane.xlu1 %1822 }
 0x33a   :  { %2236 = vperm.xlu1 %2724, %v2161_v7   ;;  %2233 = vperm.xlu0 %2723, %v2160_v8  }
 0x33b   :  { %v2798_v31 = vpop.eup %2797  ;;  %v1820_v12 = vpop.xlane.xlu0 %1819 }
 0x33c   :  { %v1943_v16 = vmul.f32 %v2798_v31, %v1823_v51 }
 0x33d   :  { %v2800_v48 = vpop.eup %2799  ;;  %v1617_v18 = vpop.xlane.xlu1 %1616 }
 0x33e   :  { %v2159_v22 = vadd.f32 %v3331_v9, %v1943_v16  ;;  %v1942_v23 = vmul.f32 %v2800_v48, %v1820_v12  ;;  %2805 = vrcp.f32 %v1617_v18 }
 0x33f   :  { %v1614_v32 = vpop.xlane.xlu0 %1613 }
 0x340   :  { %2807 = vrcp.f32 %v1614_v32  ;;  %2230 = vperm.xlu1 %2724, %v2159_v22   ;;  %v2158_v61 = vadd.f32 %v3327_v43, %v1942_v23 }
 0x341   :  { %v1853_v62 = vpop.xlane.xlu1 %1852 }
 0x343   :  { %v2802_v56 = vpop.eup %2801  ;;  %v1850_v35 = vpop.xlane.xlu0 %1849 }
 0x344   :  { %v1953_v37 = vmul.f32 %v2802_v56, %v1853_v62  ;;  %2227 = vperm.xlu1 %2724, %v2158_v61  }
 0x345   :  { %v2804_v38 = vpop.eup %2803  ;;  %v1641_v39 = vpop.xlane.xlu1 %1640 }
 0x346   :  { %v2169_v42 = vadd.f32 %v3376_v52, %v1953_v37  ;;  %v1952_v5 = vmul.f32 %v2804_v38, %v1850_v35  ;;  %2809 = vrcp.f32 %v1641_v39 }
 0x347   :  { %v1638_v46 = vpop.xlane.xlu0 %1637 }
 0x348   :  { %v2168_v9 = vadd.f32 %v3371_v44, %v1952_v5  ;;  %2811 = vrcp.f32 %v1638_v46  ;;  %2260 = vperm.xlu1 %2724, %v2169_v42  }
 0x349   :  { %v1835_v49 = vpop.xlane.xlu1 %1834 }
 0x34a   :  { %2257 = vperm.xlu0 %2723, %v2168_v9  }
 0x34b   :  { %v2806_v21 = vpop.eup %2805  ;;  %v1832_v50 = vpop.xlane.xlu0 %1831 }
 0x34c   :  { %v1947_v43 = vmul.f32 %v2806_v21, %v1835_v49 }
 0x34d   :  { %v2808_v33 = vpop.eup %2807  ;;  %v1623_v53 = vpop.xlane.xlu1 %1622 }
 0x34e   :  { %v2163_v55 = vadd.f32 %v3349_v10, %v1947_v43  ;;  %v1946_v57 = vmul.f32 %v2808_v33, %v1832_v50  ;;  %2813 = vrcp.f32 %v1623_v53 }
 0x34f   :  { %v1620_v58 = vpop.xlane.xlu0 %1619 }
 0x350   :  { %v2162_v52 = vadd.f32 %v3346_v4, %v1946_v57  ;;  %2815 = vrcp.f32 %v1620_v58  ;;  %2242 = vperm.xlu1 %2724, %v2163_v55  }
 0x351   :  { %v1859_v60 = vpop.xlane.xlu1 %1858 }
 0x352   :  { %2239 = vperm.xlu0 %2723, %v2162_v52  }
 0x353   :  { %v2810_v44 = vpop.eup %2809  ;;  %v1856_v63 = vpop.xlane.xlu0 %1855 }
 0x354   :  { %v1955_v1 = vmul.f32 %v2810_v44, %v1859_v60 }
 0x355   :  { %v2812_v45 = vpop.eup %2811  ;;  %v1659_v3 = vpop.xlane.xlu1 %1658 }
 0x356   :  { %v2171_v7 = vadd.f32 %v3385_v0, %v1955_v1  ;;  %v1954_v8 = vmul.f32 %v2812_v45, %v1856_v63  ;;  %2817 = vrcp.f32 %v1659_v3 }
 0x357   :  { %v1656_v51 = vpop.xlane.xlu0 %1655 }
 0x358   :  { %v2170_v10 = vadd.f32 %v3382_v59, %v1954_v8  ;;  %2266 = vperm.xlu1 %2724, %v2171_v7   ;;  %2819 = vrcp.f32 %v1656_v51 }
 0x359   :  { %v1841_v31 = vpop.xlane.xlu1 %1840 }
 0x35a   :  { %2263 = vperm.xlu0 %2723, %v2170_v10  }
 0x35b   :  { %v2814_v4 = vpop.eup %2813  ;;  %v1838_v12 = vpop.xlane.xlu0 %1837 }
 0x35c   :  { %v1949_v16 = vmul.f32 %v2814_v4, %v1841_v31 }
 0x35d   :  { %v2816_v48 = vpop.eup %2815  ;;  %v1629_v18 = vpop.xlane.xlu1 %1628 }
 0x35e   :  { %v2165_v22 = vadd.f32 %v3356_v24, %v1949_v16  ;;  %v1948_v23 = vmul.f32 %v2816_v48, %v1838_v12  ;;  %2821 = vrcp.f32 %v1629_v18 }
 0x35f   :  { %v1626_v32 = vpop.xlane.xlu0 %1625 }
 0x360   :  { %v2164_v0 = vadd.f32 %v3354_v20, %v1948_v23  ;;  %2823 = vrcp.f32 %v1626_v32  ;;  %2248 = vperm.xlu1 %2724, %v2165_v22  }
 0x361   :  { %v1877_v62 = vpop.xlane.xlu1 %1876 }
 0x362   :  { %2245 = vperm.xlu0 %2723, %v2164_v0  }
 0x363   :  { %v2818_v59 = vpop.eup %2817  ;;  %v1874_v61 = vpop.xlane.xlu0 %1873 }
 0x364   :  { %v1961_v56 = vmul.f32 %v2818_v59, %v1877_v62 }
 0x365   :  { %v1665_v35 = vpop.xlane.xlu1 %1664  ;;  %v2820_v24 = vpop.eup %2819 }
 0x366   :  { %v2177_v37 = vadd.f32 %v3409_v47, %v1961_v56  ;;  %2825 = vrcp.f32 %v1665_v35  ;;  %v1960_v49 = vmul.f32 %v2820_v24, %v1874_v61 }
 0x367   :  { %v1662_v38 = vpop.xlane.xlu0 %1661 }
 0x368   :  { %2284 = vperm.xlu0 %2723, %v2177_v37   ;;  %2827 = vrcp.f32 %v1662_v38  ;;  %v2176_v53 = vadd.f32 %v3404_v41, %v1960_v49 }
 0x369   :  { %v1847_v39 = vpop.xlane.xlu1 %1846 }
 0x36b   :  { %v2822_v42 = vpop.eup %2821  ;;  %v1844_v5 = vpop.xlane.xlu0 %1843 }
 0x36c   :  { %v1951_v46 = vmul.f32 %v2822_v42, %v1847_v39 }
 0x36d   :  { %v2824_v9 = vpop.eup %2823  ;;  %v1647_v20 = vpop.xlane.xlu1 %1646 }
 0x36e   :  { %v2167_v21 = vadd.f32 %v3363_v36, %v1951_v46  ;;  %v1950_v50 = vmul.f32 %v2824_v9, %v1844_v5  ;;  %2829 = vrcp.f32 %v1647_v20 }
 0x36f   :  { %v1644_v43 = vpop.xlane.xlu0 %1643 }
 0x370   :  { %v2166_v33 = vadd.f32 %v3360_v34, %v1950_v50  ;;  %2831 = vrcp.f32 %v1644_v43  ;;  %2254 = vperm.xlu1 %2724, %v2167_v21  }
 0x371   :  { %v1883_v47 = vpop.xlane.xlu1 %1882 }
 0x372   :  { %2251 = vperm.xlu0 %2723, %v2166_v33  }
 0x373   :  { %v2826_v55 = vpop.eup %2825  ;;  %v1880_v57 = vpop.xlane.xlu0 %1879 }
 0x374   :  { %v1963_v58 = vmul.f32 %v2826_v55, %v1883_v47  ;;  %2281 = vperm.xlu1 %2724, %v2176_v53  }
 0x375   :  { %v1683_v52 = vpop.xlane.xlu1 %1682  ;;  %v2828_v63 = vpop.eup %2827 }
 0x376   :  { %v2179_v60 = vadd.f32 %v3417_v40, %v1963_v58  ;;  %2833 = vrcp.f32 %v1683_v52  ;;  %v1962_v41 = vmul.f32 %v2828_v63, %v1880_v57 }
 0x377   :  { %v1680_v36 = vpop.xlane.xlu0 %1679 }
 0x378   :  { %2290 = vperm.xlu1 %2724, %v2179_v60   ;;  %2835 = vrcp.f32 %v1680_v36  ;;  %v2178_v4 = vadd.f32 %v3414_v54, %v1962_v41 }
 0x379   :  { %v1865_v44 = vpop.xlane.xlu1 %1864 }
 0x37b   :  { %v2830_v1 = vpop.eup %2829  ;;  %v1862_v34 = vpop.xlane.xlu0 %1861 }
 0x37c   :  { %v1957_v45 = vmul.f32 %v2830_v1, %v1865_v44 }
 0x37d   :  { %v2832_v3 = vpop.eup %2831  ;;  %v1653_v7 = vpop.xlane.xlu1 %1652 }
 0x37e   :  { %v2173_v8 = vadd.f32 %v3393_v17, %v1957_v45  ;;  %v1956_v51 = vmul.f32 %v2832_v3, %v1862_v34  ;;  %2837 = vrcp.f32 %v1653_v7 }
 0x37f   :  { %v1650_v10 = vpop.xlane.xlu0 %1649 }
 0x380   :  { %v2172_v31 = vadd.f32 %v3390_v11, %v1956_v51  ;;  %2839 = vrcp.f32 %v1650_v10  ;;  %2272 = vperm.xlu0 %2723, %v2173_v8  }
 0x381   :  { %v1901_v40 = vpop.xlane.xlu1 %1900 }
 0x382   :  { %2269 = vperm.xlu1 %2724, %v2172_v31  }
 0x383   :  { %v2834_v12 = vpop.eup %2833  ;;  %v1898_v16 = vpop.xlane.xlu0 %1897 }
 0x384   :  { %v1969_v48 = vmul.f32 %v2834_v12, %v1901_v40  ;;  %2287 = vperm.xlu0 %2723, %v2178_v4  }
 0x385   :  { %v1689_v18 = vpop.xlane.xlu1 %1688  ;;  %v2836_v32 = vpop.eup %2835 }
 0x386   :  { %v2185_v22 = vadd.f32 %v3437_v27, %v1969_v48  ;;  %v1968_v56 = vmul.f32 %v2836_v32, %v1898_v16 }
 0x387   :  { %v1686_v23 = vpop.xlane.xlu0 %1685 }
 0x388   :  { %2308 = vperm.xlu0 %2723, %v2185_v22   ;;  %v2184_v39 = vadd.f32 %v3435_v25, %v1968_v56 }
 0x389   :  { %v1871_v17 = vpop.xlane.xlu1 %1870 }
 0x38b   :  { %v2838_v0 = vpop.eup %2837  ;;  %v1868_v62 = vpop.xlane.xlu0 %1867 }
 0x38c   :  { %v1959_v11 = vmul.f32 %v2838_v0, %v1871_v17 }
 0x38d   :  { %v2840_v59 = vpop.eup %2839  ;;  %v1671_v61 = vpop.xlane.xlu1 %1670 }
 0x38e   :  { %v2175_v54 = vadd.f32 %v3401_v28, %v1959_v11  ;;  %v1958_v35 = vmul.f32 %v2840_v59, %v1868_v62  ;;  %2841 = vrcp.f32 %v1671_v61 }
 0x38f   :  { %v1668_v37 = vpop.xlane.xlu0 %1667 }
 0x390   :  { %v2174_v38 = vadd.f32 %v3397_v26, %v1958_v35  ;;  %2843 = vrcp.f32 %v1668_v37  ;;  %2278 = vperm.xlu1 %2724, %v2175_v54  }
 0x391   :  { %v1907_v27 = vpop.xlane.xlu1 %1906  ;;  %2845 = vrcp.f32 %v1689_v18  ;;  %v2317_v18 = vand.u32 127, %v377_v13 }
 0x392   :  { %2275 = vperm.xlu0 %2723, %v2174_v38  }
 0x393   :  { %v1904_v24 = vpop.xlane.xlu0 %1903  ;;  %v2322_v32 = vadd.s32 4294967288, %v2317_v18  ;;  %v3495_v0 = vsub.s32 %v2317_v18, %v3114_v15  ;;  %v2336_v61 = vadd.s32 4294967272, %v2317_v18 }
 0x394   :  { %2305 = vperm.xlu1 %2724, %v2184_v39  }
 0x395   :  { %v1889_v42 = vpop.xlane.xlu1 %1888  ;;  %v3501_v59 = vsub.s32 %v2322_v32, %v3114_v15 }
 0x397   :  { %v1886_v5 = vpop.xlane.xlu0 %1885 }
 0x399   :  { %v1677_v46 = vpop.xlane.xlu1 %1676 }
 0x39a   :  { %2847 = vrcp.f32 %v1677_v46 }
 0x39b   :  { %v2842_v9 = vpop.eup %2841  ;;  %2849 = vrcp.f32 %v1686_v23  ;;  %v1674_v28 = vpop.xlane.xlu0 %1673  ;;  %v2329_v23 = vadd.s32 4294967280, %v2317_v18 }
 0x39c   :  { %v1965_v20 = vmul.f32 %v2842_v9, %v1889_v42  ;;  %2851 = vrcp.f32 %v1674_v28 }
 0x39d   :  { %v2844_v49 = vpop.eup %2843  ;;  %v1895_v33 = vpop.xlane.xlu1 %1894  ;;  %v3498_v11 = vsub.s32 %v2329_v23, %v3114_v15 }
 0x39e   :  { %v2181_v26 = vadd.f32 %v3424_v6, %v1965_v20  ;;  %v1964_v21 = vmul.f32 %v2844_v49, %v1886_v5  ;;  %v2846_v25 = vpop.eup %2845  ;;  %v3516_v5 = vsub.s32 %v2336_v61, %v3114_v15 }
 0x39f   :  { %v1892_v57 = vpop.xlane.xlu0 %1891  ;;  %v1971_v58 = vmul.f32 %v2846_v25, %v1907_v27 }
 0x3a0   :  { %v2180_v50 = vadd.f32 %v3421_v2, %v1964_v21  ;;  %2296 = vperm.xlu0 %2723, %v2181_v26  }
 0x3a1   :  { %v2187_v6 = vadd.f32 %v3441_v30, %v1971_v58 }
 0x3a2   :  { %2293 = vperm.xlu1 %2724, %v2180_v50  }
 0x3a7   :  { %v2848_v43 = vpop.eup %2847 }
 0x3a8   :  { %v2850_v47 = vpop.eup %2849  ;;  %v1967_v53 = vmul.f32 %v2848_v43, %v1895_v33 }
 0x3a9   :  { %v2852_v55 = vpop.eup %2851  ;;  %v1970_v36 = vmul.f32 %v2850_v47, %v1904_v24 }
 0x3aa   :  { %v2183_v52 = vadd.f32 %v3431_v19, %v1967_v53  ;;  %v1966_v60 = vmul.f32 %v2852_v55, %v1892_v57 }
 0x3ab   :  { %v2186_v2 = vadd.f32 %v3439_v29, %v1970_v36 }
 0x3ac   :  { %v2182_v44 = vadd.f32 %v3428_v14, %v1966_v60  ;;  %2302 = vperm.xlu1 %2724, %v2183_v52  }
 0x3ae   :  { %2299 = vperm.xlu0 %2723, %v2182_v44  }
 0x3af   :  { %v2225_v3 = vpop.permute.xlu0 %2224 }
 0x3b0   :  { %2314 = vperm.xlu1 %2724, %v2187_v6   ;;  %v2326_v39 = vrot.slane %v2225_v3, %v3501_v59 }
 0x3b1   :  { %v2222_v63 = vpop.permute.xlu1 %2221 }
 0x3b2   :  { %2311 = vperm.xlu0 %2723, %v2186_v2   ;;  %v2321_v13 = vrot.slane %v2222_v63, %v3495_v0 }
 0x3b4   :  { %v2328_v28 = vsel %vm2327_vm4, %v2326_v39, %v2321_v13 }
 0x3b5   :  { %v2237_v1 = vpop.permute.xlu1 %2236  ;;  %v2234_v7 = vpop.permute.xlu0 %2233 }
 0x3b6   :  { %v2350_v54 = vrot.slane %v2237_v1, %v3501_v59  ;;  %v2346_v35 = vrot.slane %v2234_v7, %v3495_v0 }
 0x3b8   :  { %v2351_v20 = vsel %vm2327_vm4, %v2350_v54, %v2346_v35 }
 0x3bb   :  { %v3475_v34 = vpop.permute.xlu1 %2230 }
 0x3bc   :  { %v2340_v53 = vrot.slane %v3475_v34, %v3516_v5 }
 0x3bf   :  { %v2228_v45 = vpop.permute.xlu1 %2227 }
 0x3c0   :  { %v2333_v37 = vrot.slane %v2228_v45, %v3498_v11 }
 0x3c2   :  { %v2335_v49 = vsel %vm2334_vm5, %v2333_v37, %v2328_v28 }
 0x3c3   :  { %v3477_v19 = vpop.permute.xlu1 %2260  ;;  %v2342_v44 = vsel %vm2341_vm6, %v2340_v53, %v2335_v49 }
 0x3c4   :  { %v2388_v52 = vrot.slane %v3477_v19, %v3501_v59 }
 0x3c5   :  { %v3479_v41 = vpop.permute.xlu0 %2257 }
 0x3c6   :  { %v2384_v15 = vrot.slane %v3479_v41, %v3495_v0 }
 0x3c8   :  { %v2389_v63 = vsel %vm2327_vm4, %v2388_v52, %v2384_v15 }
 0x3cb   :  { %v2243_v14 = vpop.permute.xlu1 %2242 }
 0x3cc   :  { %v2360_v25 = vrot.slane %v2243_v14, %v3516_v5 }
 0x3cd   :  { %v2240_v8 = vpop.permute.xlu0 %2239 }
 0x3ce   :  { %v2355_v38 = vrot.slane %v2240_v8, %v3498_v11 }
 0x3d0   :  { %v2356_v26 = vsel %vm2334_vm5, %v2355_v38, %v2351_v20 }
 0x3d1   :  { %v2361_v60 = vsel %vm2341_vm6, %v2360_v25, %v2356_v26 }
 0x3d2   :  { %v2477_v7 = vsel %vm2476_vm7, %v2361_v60, %v2342_v44 }
 0x3d3   :  { %v3481_v51 = vpop.permute.xlu1 %2266 }
 0x3d4   :  { %v2398_v8 = vrot.slane %v3481_v51, %v3516_v5 }
 0x3d5   :  { %v3483_v30 = vpop.permute.xlu0 %2263 }
 0x3d6   :  { %v2393_v55 = vrot.slane %v3483_v30, %v3498_v11 }
 0x3d8   :  { %v2394_v19 = vsel %vm2334_vm5, %v2393_v55, %v2389_v63 }
 0x3db   :  { %v2249_v29 = vpop.permute.xlu1 %2248 }
 0x3dc   :  { %v2369_v46 = vrot.slane %v2249_v29, %v3501_v59 }
 0x3dd   :  { %v2246_v10 = vpop.permute.xlu0 %2245 }
 0x3de   :  { %v2365_v27 = vrot.slane %v2246_v10, %v3495_v0 }
 0x3e0   :  { %v2370_v21 = vsel %vm2327_vm4, %v2369_v46, %v2365_v27 }
 0x3e3   :  { %v3485_v40 = vpop.permute.xlu0 %2284 }
 0x3e4   :  { %v2426_v30 = vrot.slane %v3485_v40, %v3501_v59 }
 0x3eb   :  { %v2255_v31 = vpop.permute.xlu1 %2254 }
 0x3ec   :  { %v2379_v57 = vrot.slane %v2255_v31, %v3516_v5 }
 0x3ed   :  { %v2252_v12 = vpop.permute.xlu0 %2251 }
 0x3ee   :  { %v2374_v24 = vrot.slane %v2252_v12, %v3498_v11 }
 0x3ef   :  { %v3487_v4 = vpop.permute.xlu1 %2281 }
 0x3f0   :  { %v2375_v43 = vsel %vm2334_vm5, %v2374_v24, %v2370_v21  ;;  %v2422_v1 = vrot.slane %v3487_v4, %v3495_v0 }
 0x3f1   :  { %v2380_v6 = vsel %vm2341_vm6, %v2379_v57, %v2375_v43 }
 0x3f2   :  { %v2479_v29 = vsel %vm2478_vm8, %v2380_v6, %v2477_v7  ;;  %v2427_v18 = vsel %vm2327_vm4, %v2426_v30, %v2422_v1 }
 0x3f3   :  { %v3489_v48 = vpop.permute.xlu1 %2290 }
 0x3f4   :  { %v2436_v61 = vrot.slane %v3489_v48, %v3516_v5 }
 0x3fb   :  { %v2273_v16 = vpop.permute.xlu0 %2272 }
 0x3fc   :  { %v2407_v58 = vrot.slane %v2273_v16, %v3501_v59  ;;  %v2399_v16 = vsel %vm2341_vm6, %v2398_v8, %v2394_v19 }
 0x3fd   :  { %v2270_v22 = vpop.permute.xlu1 %2269  ;;  %v2481_v23 = vsel %vm2480_vm9, %v2399_v16, %v2479_v29 }
 0x3fe   :  { %v2403_v50 = vrot.slane %v2270_v22, %v3495_v0 }
 0x3ff   :  { %v3492_v17 = vpop.permute.xlu0 %2287 }
 0x400   :  { %v2408_v2 = vsel %vm2327_vm4, %v2407_v58, %v2403_v50  ;;  %v2431_v41 = vrot.slane %v3492_v17, %v3498_v11 }
 0x402   :  { %v2432_v40 = vsel %vm2334_vm5, %v2431_v41, %v2427_v18 }
 0x403   :  { %v3503_v56 = vpop.permute.xlu0 %2308  ;;  %v2437_v38 = vsel %vm2341_vm6, %v2436_v61, %v2432_v40 }
 0x404   :  { %v2464_v13 = vrot.slane %v3503_v56, %v3501_v59 }
 0x40b   :  { %v2279_v62 = vpop.permute.xlu1 %2278 }
 0x40c   :  { %v2417_v14 = vrot.slane %v2279_v62, %v3516_v5 }
 0x40d   :  { %v2276_v9 = vpop.permute.xlu0 %2275 }
 0x40e   :  { %v2412_v33 = vrot.slane %v2276_v9, %v3498_v11 }
 0x40f   :  { %v3513_v42 = vpop.permute.xlu1 %2305 }
 0x410   :  { %v2413_v34 = vsel %vm2334_vm5, %v2412_v33, %v2408_v2  ;;  %v2460_v51 = vrot.slane %v3513_v42, %v3495_v0 }
 0x411   :  { %v2418_v4 = vsel %vm2341_vm6, %v2417_v14, %v2413_v34 }
 0x412   :  { %v2483_v54 = vsel %vm2482_vm10, %v2418_v4, %v2481_v23  ;;  %v2465_v27 = vsel %vm2327_vm4, %v2464_v13, %v2460_v51 }
 0x41b   :  { %v2297_v36 = vpop.permute.xlu0 %2296 }
 0x41c   :  { %v2445_v10 = vrot.slane %v2297_v36, %v3501_v59  ;;  %v2485_v59 = vsel %vm2484_vm11, %v2437_v38, %v2483_v54 }
 0x41d   :  { %v2294_v47 = vpop.permute.xlu1 %2293 }
 0x41e   :  { %v2441_v45 = vrot.slane %v2294_v47, %v3495_v0 }
 0x420   :  { %v2446_v22 = vsel %vm2327_vm4, %v2445_v10, %v2441_v45 }
 0x427   :  { %v2303_v3 = vpop.permute.xlu1 %2302 }
 0x428   :  { %v2455_v17 = vrot.slane %v2303_v3, %v3516_v5 }
 0x429   :  { %v2300_v31 = vpop.permute.xlu0 %2299 }
 0x42a   :  { %v2450_v12 = vrot.slane %v2300_v31, %v3498_v11 }
 0x42b   :  { %v2315_v62 = vpop.permute.xlu1 %2314 }
 0x42c   :  { %v2451_v32 = vsel %vm2334_vm5, %v2450_v12, %v2446_v22  ;;  %v2474_v39 = vrot.slane %v2315_v62, %v3516_v5 }
 0x42d   :  { %v2312_v35 = vpop.permute.xlu0 %2311  ;;  %v2456_v0 = vsel %vm2341_vm6, %v2455_v17, %v2451_v32 }
 0x42e   :  { %v2469_v37 = vrot.slane %v2312_v35, %v3498_v11  ;;  %v2487_v24 = vsel %vm2486_vm12, %v2456_v0, %v2485_v59 }
 0x430   :  { %v2470_v48 = vsel %vm2334_vm5, %v2469_v37, %v2465_v27 }
 0x431   :  { %v2475_v56 = vsel %vm2341_vm6, %v2474_v39, %v2470_v48 }
 0x432   :  { %v2489_v42 = vsel %vm2488_vm13, %v2475_v56, %v2487_v24 }
 0x433   :  { %2491 = vst.msk [vmem:[#allocation13] sm:$0xff] %vm121_vm1, %v2489_v42 }
 0x434   :  { %2984 = shalt.err (!%p2981_p6)
}
 0x435   :  { %2501 = dma.vmem_to_hbm [thread:$0]  %s2499_s18, 128, %s3592_s9, [#allocation4]  }
 0x436   :  { %3001 = dma.done.wait [#allocation4], 128  }
 0x437   :  { %3002 = vsyncadd [#allocation4], 4294967168 }
 0x438   :  { %2505 = vsyncpa [#allocation3], 1 }
 0x439   :  { %2506 = vsyncpa [#allocation6], 1 }
 0x43a   :  { %2507 = vsyncpa [#allocation9], 1 }
 0x43b   :  { %2508 = vsyncpa [#allocation12], 1 }
 0x43c   :  { %2509 = vsyncpa [#allocation4], 1 }

</bundles_post_ra>
